<compile_context>
chip_gen: v5e
topology: v5e:2x2
jax: 0.10.0
libtpu: 0.0.40
codegen_flags: <defaults>
</compile_context>

<pallas_src>
import numpy as np
import jax
import jax.numpy as jnp
from jax import lax
from jax.experimental import pallas as pl
from jax.experimental.pallas import tpu as pltpu

_BATCH_TILE = 8  # sublane count; batch is padded up to a multiple of this.


def _dft_mats(seq_len: int):
    """Real DFT / inverse-DFT matrices for a length-2S zero-padded transform.

    Angles are computed from (n*j mod N) in exact integer arithmetic and in
    float64, so the f32 matrices are accurate to ~1 ulp (no argument-reduction
    error for large n*j).
    """
    n_fft = 2 * seq_len
    n = np.arange(seq_len, dtype=np.int64)[:, None]   # time index (pad rows are zero -> dropped)
    j = np.arange(n_fft, dtype=np.int64)[None, :]     # frequency index
    ang = 2.0 * np.pi * ((n * j) % n_fft) / n_fft
    cos_f = np.cos(ang)                               # (S, 2S)  Re of exp(-i*ang)
    sin_f = -np.sin(ang)                              # (S, 2S)  Im of exp(-i*ang)

    jj = np.arange(n_fft, dtype=np.int64)[:, None]
    kk = np.arange(n_fft, dtype=np.int64)[None, :]
    ang_i = 2.0 * np.pi * ((jj * kk) % n_fft) / n_fft
    cos_i = np.cos(ang_i) / n_fft                     # (2S, 2S)  Re of ifft, 1/N folded in
    return (jnp.asarray(cos_f, jnp.float32),
            jnp.asarray(sin_f, jnp.float32),
            jnp.asarray(cos_i, jnp.float32))


def _autocorr_kernel(x_ref, cf_ref, sf_ref, ci_ref, out_ref):
    x = x_ref[...]                                   # (TB, S) f32, S on lanes
    seq_len = x.shape[-1]
    hi = lax.Precision.HIGHEST

    # FFT of the zero-padded signal == x @ (first S rows of the 2S-point DFT matrix).
    xr = jnp.dot(x, cf_ref[...], precision=hi, preferred_element_type=jnp.float32)  # (TB, 2S)
    xi = jnp.dot(x, sf_ref[...], precision=hi, preferred_element_type=jnp.float32)  # (TB, 2S)
    psd = xr * xr + xi * xi                          # X * conj(X)  (real, imag is exactly 0)

    # ifft(psd).real == psd @ cos-matrix / N  (1/N already folded into ci_ref).
    corr = jnp.dot(psd, ci_ref[...], precision=hi, preferred_element_type=jnp.float32)  # (TB, 2S)

    # Max over the full 2S lags (exactly as the reference), clamp, normalise.
    mx = jnp.maximum(jnp.max(corr, axis=-1, keepdims=True), 1e-6)
    # approx=True (EUP vrcp) was considered per the review; exact is kept since it is
    # one scalar per row and preserves bit-level fidelity to the reference divide.
    inv = pl.reciprocal(mx, approx=False)
    out_ref[...] = corr[:, :seq_len] * inv


@jax.jit
def autocorr(x):
    """Pallas TPU forward of AutocorrModule; x: (batch, seq_len) float."""
    x = jnp.asarray(x, jnp.float32)
    batch, seq_len = x.shape
    n_fft = 2 * seq_len
    cf, sf, ci = _dft_mats(seq_len)                  # trace-time constants

    pad_b = (-batch) % _BATCH_TILE
    xp = jnp.pad(x, ((0, pad_b), (0, 0))) if pad_b else x
    bp = batch + pad_b

    out = pl.pallas_call(
        _autocorr_kernel,
        out_shape=jax.ShapeDtypeStruct((bp, seq_len), jnp.float32),
        grid=(bp // _BATCH_TILE,),
        in_specs=[
            pl.BlockSpec((_BATCH_TILE, seq_len), lambda i: (i, 0)),   # x batch tile
            pl.BlockSpec((seq_len, n_fft), lambda i: (0, 0)),         # cos DFT (resident)
            pl.BlockSpec((seq_len, n_fft), lambda i: (0, 0)),         # -sin DFT (resident)
            pl.BlockSpec((n_fft, n_fft), lambda i: (0, 0)),           # cos IDFT / N (resident)
        ],
        out_specs=pl.BlockSpec((_BATCH_TILE, seq_len), lambda i: (i, 0)),
        compiler_params=pltpu.CompilerParams(
            dimension_semantics=("parallel",)),      # batch tiles split across TCs on v7x
    )(xp, cf, sf, ci)
    return out[:batch] if pad_b else out


def _reference(x):
    # The original FFT-based formulation, evaluated with jnp.fft.
    b, s = x.shape
    xp = jnp.pad(x, ((0, 0), (0, s)))
    xf = jnp.fft.fft(xp)
    corr = jnp.fft.ifft(xf * jnp.conj(xf)).real
    mx = jnp.maximum(jnp.max(corr, axis=1, keepdims=True), 1e-6)
    return (corr / mx)[:, :s]


if __name__ == "__main__":
    key = jax.random.PRNGKey(0)

    # Primary (lane/sublane-dense) shape: batch=8 sublanes, seq_len=128 lanes.
    k1, k2 = jax.random.split(key)
    x = jax.random.normal(k1, (8, 128), jnp.float32)
    out = jax.block_until_ready(autocorr(x))
    assert out.shape == (8, 128) and out.dtype == jnp.float32
    np.testing.assert_allclose(np.asarray(out), np.asarray(_reference(x)),
                               atol=2e-2, rtol=2e-2)

    # Small irregular shape (exercises batch padding + non-128 seq_len path).
    x2 = jax.random.normal(k2, (2, 16), jnp.float32)
    out2 = jax.block_until_ready(autocorr(x2))
    assert out2.shape == (2, 16) and out2.dtype == jnp.float32
    np.testing.assert_allclose(np.asarray(out2), np.asarray(_reference(x2)),
                               atol=2e-2, rtol=2e-2)

    print("KERNEL_OK")
</pallas_src>

<mosaic_0001>
module attributes {stable_mosaic.version = 11 : i64} {
  func.func @_autocorr_kernel(%arg0: i32, %arg1: memref<8x128xf32, #tpu.memory_space<vmem>>, %arg2: memref<128x256xf32, #tpu.memory_space<vmem>>, %arg3: memref<128x256xf32, #tpu.memory_space<vmem>>, %arg4: memref<256x256xf32, #tpu.memory_space<vmem>>, %arg5: memref<8x128xf32, #tpu.memory_space<vmem>>) attributes {dimension_semantics = [#tpu.dimension_semantics<parallel>], iteration_bounds = array<i64: 1>, scalar_prefetch = 0 : i64, scratch_operands = 0 : i64, tpu.core_type = #tpu.core_type<tc>, window_params = [{transform_indices = @transform_0, window_bounds = array<i64: 8, 128>}, {pipeline_mode = #tpu.pipeline_mode<synchronous>, transform_indices = @transform_1, window_bounds = array<i64: 128, 256>}, {pipeline_mode = #tpu.pipeline_mode<synchronous>, transform_indices = @transform_2, window_bounds = array<i64: 128, 256>}, {pipeline_mode = #tpu.pipeline_mode<synchronous>, transform_indices = @transform_3, window_bounds = array<i64: 256, 256>}, {transform_indices = @transform_4, window_bounds = array<i64: 8, 128>}]} {
    %c0 = arith.constant 0 : index
    %c0_0 = arith.constant 0 : index
    %0 = vector.load %arg1[%c0, %c0_0] : memref<8x128xf32, #tpu.memory_space<vmem>>, vector<8x128xf32>
    %c0_1 = arith.constant 0 : index
    %c0_2 = arith.constant 0 : index
    %1 = vector.load %arg2[%c0_1, %c0_2] : memref<128x256xf32, #tpu.memory_space<vmem>>, vector<128x256xf32>
    %cst = arith.constant dense<0.000000e+00> : vector<8x256xf32>
    %2 = tpu.matmul %0, %1, %cst {dimension_numbers = #tpu.dot_dimension_numbers<[1], [0], [0], [1], [0, 0, 1, 1], [], []>, precision = #tpu.contract_precision<fp32>} : vector<8x128xf32>, vector<128x256xf32>, vector<8x256xf32> -> vector<8x256xf32>
    %c0_3 = arith.constant 0 : index
    %c0_4 = arith.constant 0 : index
    %3 = vector.load %arg3[%c0_3, %c0_4] : memref<128x256xf32, #tpu.memory_space<vmem>>, vector<128x256xf32>
    %cst_5 = arith.constant dense<0.000000e+00> : vector<8x256xf32>
    %4 = tpu.matmul %0, %3, %cst_5 {dimension_numbers = #tpu.dot_dimension_numbers<[1], [0], [0], [1], [0, 0, 1, 1], [], []>, precision = #tpu.contract_precision<fp32>} : vector<8x128xf32>, vector<128x256xf32>, vector<8x256xf32> -> vector<8x256xf32>
    %5 = arith.mulf %2, %2 : vector<8x256xf32>
    %6 = arith.mulf %4, %4 : vector<8x256xf32>
    %7 = arith.addf %5, %6 : vector<8x256xf32>
    %c0_6 = arith.constant 0 : index
    %c0_7 = arith.constant 0 : index
    %8 = vector.load %arg4[%c0_6, %c0_7] : memref<256x256xf32, #tpu.memory_space<vmem>>, vector<256x256xf32>
    %cst_8 = arith.constant dense<0.000000e+00> : vector<8x256xf32>
    %9 = tpu.matmul %7, %8, %cst_8 {dimension_numbers = #tpu.dot_dimension_numbers<[1], [0], [0], [1], [0, 0, 1, 1], [], []>, precision = #tpu.contract_precision<fp32>} : vector<8x256xf32>, vector<256x256xf32>, vector<8x256xf32> -> vector<8x256xf32>
    %cst_9 = arith.constant dense<0xFF800000> : vector<8xf32>
    %10 = vector.multi_reduction <maximumf>, %9, %cst_9 [1] : vector<8x256xf32> to vector<8xf32>
    %11 = vector.shape_cast %10 : vector<8xf32> to vector<8x1xf32>
    %cst_10 = arith.constant 9.99999997E-7 : f32
    %12 = vector.broadcast %cst_10 : f32 to vector<8x1xf32>
    %13 = arith.maximumf %11, %12 : vector<8x1xf32>
    %14 = tpu.reciprocal %13 : vector<8x1xf32> -> vector<8x1xf32>
    %15 = vector.extract_strided_slice %9 {offsets = [0, 0], sizes = [8, 128], strides = [1, 1]} : vector<8x256xf32> to vector<8x128xf32>
    %16 = vector.broadcast %14 : vector<8x1xf32> to vector<8x128xf32>
    %17 = arith.mulf %15, %16 : vector<8x128xf32>
    %c0_11 = arith.constant 0 : index
    %c0_12 = arith.constant 0 : index
    %18 = vector.load %arg5[%c0_11, %c0_12] : memref<8x128xf32, #tpu.memory_space<vmem>>, vector<8x128xf32>
    tpu.vector_store %arg5[%c0_11, %c0_12], %17 {strides = array<i32>} : memref<8x128xf32, #tpu.memory_space<vmem>>, vector<8x128xf32>,
    return
  }
  func.func @transform_0(%arg0: i32) -> (i32, i32) {
    %c0_i32 = arith.constant 0 : i32
    %c0_i32_0 = arith.constant 0 : i32
    return %arg0, %c0_i32 : i32, i32
  }
  func.func @transform_1(%arg0: i32) -> (i32, i32) {
    %c0_i32 = arith.constant 0 : i32
    %c0_i32_0 = arith.constant 0 : i32
    %c0_i32_1 = arith.constant 0 : i32
    return %c0_i32, %c0_i32_0 : i32, i32
  }
  func.func @transform_2(%arg0: i32) -> (i32, i32) {
    %c0_i32 = arith.constant 0 : i32
    %c0_i32_0 = arith.constant 0 : i32
    %c0_i32_1 = arith.constant 0 : i32
    return %c0_i32, %c0_i32_0 : i32, i32
  }
  func.func @transform_3(%arg0: i32) -> (i32, i32) {
    %c0_i32 = arith.constant 0 : i32
    %c0_i32_0 = arith.constant 0 : i32
    %c0_i32_1 = arith.constant 0 : i32
    return %c0_i32, %c0_i32_0 : i32, i32
  }
  func.func @transform_4(%arg0: i32) -> (i32, i32) {
    %c0_i32 = arith.constant 0 : i32
    %c0_i32_0 = arith.constant 0 : i32
    return %arg0, %c0_i32 : i32, i32
  }
}

</mosaic_0001>

<bundles_post_ra>
// kernel: autocorr.1
= control target key start
LH: loop header
LB: loop body
LE: loop exit
PB: predicated region body
PF: predicated region fallthrough
CT: control target
= control target key end

     0   :  { %9 = vsyncpa [#allocation3], 0  ;;  %s5193_s0 = inlined_call_operand.hbm [shape: f32[8,128], index: 0, kind: input, shape index: {}]   ;;  %s5194_s1 = inlined_call_operand.hbm [shape: f32[128,256], index: 1, kind: input, shape index: {}]   ;;  %s5195_s2 = inlined_call_operand.hbm [shape: f32[128,256], index: 2, kind: input, shape index: {}]   ;;  %s5196_s3 = inlined_call_operand.hbm [shape: f32[256,256], index: 3, kind: input, shape index: {}]   ;;  %s5197_s4 = inlined_call_operand.hbm [shape: f32[8,128], index: 4, kind: output, shape index: {}]  }
   0x1   :  { %10 = vsyncpa [#allocation6], 0 }
   0x2   :  { %11 = vsyncpa [#allocation9], 0  ;;  %s28_s17 = sshll.u32 %s5194_s1, 4  ;;  %s29_s17 = int_to_ptr.hbm [resolvable:$true] %s28_s17 }
   0x3   :  { %12 = vsyncpa [#allocation4], 0  ;;  %s3118_s18 = smov [#allocation5]   ;;  %s18_s22 = sshll.u32 %s5193_s0, 4  ;;  %s19_s22 = int_to_ptr.hbm [resolvable:$true] %s18_s22 }
   0x4   :  { %s30_s19 = sshll.u32 %s3118_s18, 4  ;;  %s3119_s23 = smov 256   ;;  %s31_s19 = int_to_ptr.vmem [resolvable:$true] %s30_s19 }
   0x5   :  { %s3120_s24 = smov 16   ;;  %s3121_s25 = smov [#allocation2]  }
   0x6   :  { %36 = dma.hbm_to_vmem [thread:$0]  %s29_s17, 4096, %s31_s19, [#allocation6], %s3119_s23, %s3119_s23, %s3120_s24  }
   0x7   :  { %s20_s26 = sshll.u32 %s3121_s25, 4  ;;  %s41_s29 = sshll.u32 %s5195_s2, 4  ;;  %s21_s26 = int_to_ptr.vmem [resolvable:$true] %s20_s26  ;;  %s42_s29 = int_to_ptr.hbm [resolvable:$true] %s41_s29 }
   0x8   :  { %23 = dma.hbm_to_vmem [thread:$0]  %s19_s22, 128, %s21_s26, [#allocation3]  }
   0x9   :  { %s54_s5 = sshll.u32 %s5196_s3, 4  ;;  %s3122_s6 = smov [#allocation7]   ;;  %s55_s5 = int_to_ptr.hbm [resolvable:$true] %s54_s5 }
   0xa   :  { %s43_s7 = sshll.u32 %s3122_s6, 4  ;;  %s3123_s0 = smov [#allocation8]   ;;  %s44_s7 = int_to_ptr.vmem [resolvable:$true] %s43_s7 }
   0xb   :  { %49 = dma.hbm_to_vmem [thread:$0]  %s42_s29, 4096, %s44_s7, [#allocation6], %s3119_s23, %s3119_s23, %s3120_s24  }
   0xc   :  { %s56_s8 = sshll.u32 %s3123_s0, 4  ;;  %s57_s8 = int_to_ptr.vmem [resolvable:$true] %s56_s8 }
   0xd   :  { %62 = dma.hbm_to_vmem [thread:$0]  %s55_s5, 8192, %s57_s8, [#allocation9], %s3119_s23, %s3119_s23, %s3120_s24  }
   0xe   :  { %3110 = dma.done.wait [#allocation3], 128  }
   0xf   :  { %3111 = vsyncadd [#allocation3], 4294967168 }
  0x10   :  { %3112 = dma.done.wait [#allocation6], 8192  }
  0x11   :  { %3113 = vsyncadd [#allocation6], 4294959104 }
  0x12   :  { %3114 = dma.done.wait [#allocation9], 8192  }
  0x13   :  { %3115 = vsyncadd [#allocation9], 4294959104  ;;  %v110_v0 = vld [vmem:[#allocation5 + $0xf0] sm:$0xff]  ;;  %v108_v1 = vld [vmem:[#allocation5 + $0xe0] sm:$0xff]  ;;  %s3124_s2 = smov [#allocation10]   ;;  %s2969_s11 = sshll.u32 %s5197_s4, 4  ;;  %s2970_s11 = int_to_ptr.hbm [resolvable:$true] %s2969_s11 }
  0x14   :  { %v106_v2 = vld [vmem:[#allocation5 + $0xd0] sm:$0xff]  ;;  %v3162_v3 = vand.u32 4294901760, %v110_v0  ;;  %v3164_v4 = vand.u32 4294901760, %v108_v1  ;;  %v104_v6 = vld [vmem:[#allocation5 + $0xc0] sm:$0xff]  ;;  %v111_v55 = vld [vmem:[#allocation5 + $0xf8] sm:$0xff]  ;;  %s2967_s3 = sshll.u32 %s3124_s2, 4  ;;  %s2968_s3 = int_to_ptr.vmem [resolvable:$true] %s2967_s3 }
  0x15   :  { %v3166_v5 = vand.u32 4294901760, %v106_v2  ;;  %v102_v7 = vld [vmem:[#allocation5 + $0xb0] sm:$0xff]  ;;  %v100_v8 = vld [vmem:[#allocation5 + $0xa0] sm:$0xff]  ;;  %v3168_v9 = vand.u32 4294901760, %v104_v6  ;;  %v109_v63 = vld [vmem:[#allocation5 + $0xe8] sm:$0xff] }
  0x16   :  { %v3170_v10 = vand.u32 4294901760, %v102_v7  ;;  %v3172_v11 = vand.u32 4294901760, %v100_v8  ;;  %v98_v12 = vld [vmem:[#allocation5 + $0x90] sm:$0xff]  ;;  %v96_v13 = vld [vmem:[#allocation5 + $0x80] sm:$0xff]  ;;  %113 = vmatpush.msra.mxu0 %v3162_v3  ;;  %v3176_v14 = vsub.f32 %v110_v0, %v3162_v3  ;;  %v3179_v15 = vsub.f32 %v108_v1, %v3164_v4  ;;  %309 = vmatpush.msra.mxu3 %v3162_v3 }
  0x17   :  { %v3183_v16 = vsub.f32 %v106_v2, %v3166_v5  ;;  %v3185_v17 = vand.u32 4294901760, %v98_v12  ;;  %v3188_v18 = vsub.f32 %v104_v6, %v3168_v9  ;;  %v94_v21 = vld [vmem:[#allocation5 + $0x70] sm:$0xff]  ;;  %v3201_v25 = vand.u32 4294901760, %v96_v13  ;;  %v92_v34 = vld [vmem:[#allocation5 + $0x60] sm:$0xff] }
  0x18   :  { %v3191_v19 = vsub.f32 %v102_v7, %v3170_v10  ;;  %v3194_v20 = vsub.f32 %v100_v8, %v3172_v11  ;;  %256 = vmatpush.msra.mxu2 %v3176_v14  ;;  %115 = vmatpush.msra.mxu0 %v3164_v4  ;;  %v5212_v22 = vand.u32 4294901760, %v3176_v14  ;;  %v5211_v23 = vand.u32 4294901760, %v3179_v15  ;;  %v90_v35 = vld [vmem:[#allocation5 + $0x50] sm:$0xff]  ;;  %v88_v40 = vld [vmem:[#allocation5 + $0x40] sm:$0xff] }
  0x19   :  { %v5210_v24 = vand.u32 4294901760, %v3183_v16  ;;  %311 = vmatpush.msra.mxu3 %v3164_v4  ;;  %v5207_v26 = vand.u32 4294901760, %v3188_v18  ;;  %v3207_v28 = vsub.f32 %v98_v12, %v3185_v17  ;;  %v3220_v32 = vand.u32 4294901760, %v94_v21  ;;  %v86_v48 = vld [vmem:[#allocation5 + $0x30] sm:$0xff]  ;;  %v84_v53 = vld [vmem:[#allocation5 + $0x20] sm:$0xff] }
  0x1a   :  { %v5206_v27 = vand.u32 4294901760, %v3191_v19  ;;  %259 = vmatpush.msra.mxu2 %v3179_v15  ;;  %117 = vmatpush.msra.mxu0 %v3166_v5  ;;  %v156_v29 = vsub.f32 %v3176_v14, %v5212_v22  ;;  %v162_v30 = vsub.f32 %v3179_v15, %v5211_v23  ;;  %v5204_v33 = vand.u32 4294901760, %v3194_v20  ;;  %v82_v60 = vld [vmem:[#allocation5 + $0x10] sm:$0xff]  ;;  %v80_v6 = vld [vmem:[#allocation5] sm:$0xff] }
  0x1b   :  { %v168_v31 = vsub.f32 %v3183_v16, %v5210_v24  ;;  %313 = vmatpush.msra.mxu3 %v3166_v5  ;;  %v174_v38 = vsub.f32 %v3188_v18, %v5207_v26  ;;  %v3230_v39 = vsub.f32 %v96_v13, %v3201_v25  ;;  %v3237_v42 = vsub.f32 %v94_v21, %v3220_v32  ;;  %v107_v13 = vld [vmem:[#allocation5 + $0xd8] sm:$0xff] }
  0x1c   :  { %v157_v36 = vand.u32 4294901760, %v156_v29  ;;  %262 = vmatpush.msra.mxu2 %v3183_v16  ;;  %119 = vmatpush.msra.mxu0 %v3168_v9  ;;  %v163_v37 = vand.u32 4294901760, %v162_v30  ;;  %v180_v41 = vsub.f32 %v3191_v19, %v5206_v27  ;;  %v5203_v44 = vand.u32 4294901760, %v3207_v28 }
  0x1d   :  { %315 = vmatpush.msra.mxu3 %v3168_v9  ;;  %v169_v43 = vand.u32 4294901760, %v168_v31  ;;  %v3241_v45 = vand.u32 4294901760, %v92_v34  ;;  %v3243_v46 = vand.u32 4294901760, %v90_v35  ;;  %v3247_v47 = vand.u32 4294901760, %v88_v40 }
  0x1e   :  { %158 = vmatpush.msra.mxu1 %v157_v36  ;;  %265 = vmatpush.msra.mxu2 %v3188_v18  ;;  %v175_v49 = vand.u32 4294901760, %v174_v38  ;;  %v186_v50 = vsub.f32 %v3194_v20, %v5204_v33  ;;  %v5202_v51 = vand.u32 4294901760, %v3230_v39  ;;  %v5200_v54 = vand.u32 4294901760, %v3237_v42  ;;  %v97_v33 = vld [vmem:[#allocation5 + $0x88] sm:$0xff] }
  0x1f   :  { %121 = vmatpush.msra.mxu0 %v3170_v10  ;;  %317 = vmatpush.msra.mxu3 %v3170_v10  ;;  %v3255_v52 = vsub.f32 %v92_v34, %v3241_v45  ;;  %v181_v56 = vand.u32 4294901760, %v180_v41  ;;  %v192_v57 = vsub.f32 %v3207_v28, %v5203_v44  ;;  %v3265_v58 = vsub.f32 %v90_v35, %v3243_v46 }
  0x20   :  { %164 = vmatpush.msra.mxu1 %v163_v37  ;;  %268 = vmatpush.msra.mxu2 %v3191_v19  ;;  %v3267_v59 = vand.u32 4294901760, %v86_v48  ;;  %v3272_v61 = vsub.f32 %v88_v40, %v3247_v47  ;;  %v3274_v62 = vand.u32 4294901760, %v84_v53  ;;  %v187_v0 = vand.u32 4294901760, %v186_v50  ;;  %v105_v37 = vld [vmem:[#allocation5 + $0xc8] sm:$0xff]  ;;  %v103_v50 = vld [vmem:[#allocation5 + $0xb8] sm:$0xff] }
  0x21   :  { %123 = vmatpush.msra.mxu0 %v3172_v11  ;;  %319 = vmatpush.msra.mxu3 %v3172_v11  ;;  %v198_v1 = vsub.f32 %v3230_v39, %v5202_v51  ;;  %v5199_v2 = vand.u32 4294901760, %v3255_v52  ;;  %v3281_v7 = vand.u32 4294901760, %v111_v55  ;;  %v204_v8 = vsub.f32 %v3237_v42, %v5200_v54  ;;  %v99_v54 = vld [vmem:[#allocation5 + $0x98] sm:$0xff] }
  0x22   :  { %170 = vmatpush.msra.mxu1 %v169_v43  ;;  %271 = vmatpush.msra.mxu2 %v3194_v20  ;;  %v3288_v12 = vand.u32 4294901760, %v82_v60  ;;  %v193_v21 = vand.u32 4294901760, %v192_v57  ;;  %v5198_v29 = vand.u32 4294901760, %v3265_v58  ;;  %v3293_v30 = vsub.f32 %v86_v48, %v3267_v59 }
  0x23   :  { %125 = vmatpush.msra.mxu0 %v3185_v17  ;;  %321 = vmatpush.msra.mxu3 %v3185_v17  ;;  %v3295_v31 = vand.u32 4294901760, %v109_v63  ;;  %v5201_v34 = vand.u32 4294901760, %v3272_v61  ;;  %v3301_v35 = vsub.f32 %v84_v53, %v3274_v62  ;;  %v3303_v36 = vand.u32 4294901760, %v80_v6 }
  0x24   :  { %176 = vmatpush.msra.mxu1 %v175_v49  ;;  %274 = vmatpush.msra.mxu2 %v3207_v28  ;;  %5303 = vst [vmem:[#allocation15_spill] sm:$0xff] %v3288_v12  ;;  %v199_v38 = vand.u32 4294901760, %v198_v1  ;;  %v210_v40 = vsub.f32 %v3255_v52, %v5199_v2  ;;  %v3310_v41 = vsub.f32 %v111_v55, %v3281_v7  ;;  %v3312_v43 = vand.u32 4294901760, %v107_v13 }
  0x25   :  { %127 = vmatpush.msra.mxu0 %v3201_v25  ;;  %323 = vmatpush.msra.mxu3 %v3201_v25  ;;  %5304 = vst [vmem:[#allocation16_spill] sm:$0xff] %v3303_v36  ;;  %v205_v48 = vand.u32 4294901760, %v204_v8  ;;  %v3317_v49 = vsub.f32 %v82_v60, %v3288_v12  ;;  %v216_v53 = vsub.f32 %v3265_v58, %v5198_v29  ;;  %v5205_v55 = vand.u32 4294901760, %v3293_v30 }
  0x26   :  { %182 = vmatpush.msra.mxu1 %v181_v56  ;;  %277 = vmatpush.msra.mxu2 %v3230_v39  ;;  %v3325_v56 = vsub.f32 %v109_v63, %v3295_v31  ;;  %v3327_v57 = vand.u32 4294901760, %v105_v37  ;;  %v222_v60 = vsub.f32 %v3272_v61, %v5201_v34  ;;  %v5208_v1 = vand.u32 4294901760, %v3301_v35 }
  0x27   :  { %129 = vmatpush.msra.mxu0 %v3220_v32  ;;  %325 = vmatpush.msra.mxu3 %v3220_v32  ;;  %v3336_v8 = vsub.f32 %v80_v6, %v3303_v36  ;;  %v211_v63 = vand.u32 4294901760, %v210_v40  ;;  %v3341_v29 = vsub.f32 %v107_v13, %v3312_v43  ;;  %v3343_v2 = vand.u32 4294901760, %v103_v50 }
  0x28   :  { %188 = vmatpush.msra.mxu1 %v187_v0  ;;  %280 = vmatpush.msra.mxu2 %v3237_v42  ;;  %5305 = vst [vmem:[#allocation17_spill] sm:$0xff] %v3325_v56  ;;  %v101_v0 = vld [vmem:[#allocation5 + $0xa8] sm:$0xff]  ;;  %v5214_v34 = vand.u32 4294901760, %v3317_v49  ;;  %v228_v13 = vsub.f32 %v3293_v30, %v5205_v55  ;;  %v5213_v40 = vand.u32 4294901760, %v3325_v56  ;;  %v3356_v51 = vsub.f32 %v105_v37, %v3327_v57 }
  0x29   :  { %131 = vmatpush.msra.mxu0 %v3241_v45  ;;  %327 = vmatpush.msra.mxu3 %v3241_v45  ;;  %5306 = vst [vmem:[#allocation18_spill] sm:$0xff] %v3341_v29  ;;  %v3348_v6 = vand.u32 4294901760, %v101_v0  ;;  %v5217_v44 = vand.u32 4294901760, %v3336_v8  ;;  %v223_v55 = vand.u32 4294901760, %v222_v60  ;;  %v5218_v27 = vand.u32 4294901760, %v3341_v29  ;;  %v95_v60 = vld [vmem:[#allocation5 + $0x78] sm:$0xff] }
  0x2a   :  { %194 = vmatpush.msra.mxu1 %v193_v21  ;;  %283 = vmatpush.msra.mxu2 %v3255_v52  ;;  %v5209_v21 = vand.u32 4294901760, %v3310_v41  ;;  %5307 = vst [vmem:[#allocation19_spill] sm:$0xff] %v3356_v51  ;;  %v3372_v26 = vsub.f32 %v103_v50, %v3343_v2  ;;  %v503_v50 = vsub.f32 %v3325_v56, %v5213_v40  ;;  %v3387_v23 = vand.u32 4294901760, %v97_v33 }
  0x2b   :  { %133 = vmatpush.msra.mxu0 %v3243_v46  ;;  %329 = vmatpush.msra.mxu3 %v3243_v46  ;;  %v3402_v24 = vand.u32 4294901760, %v95_v60 }
  0x2c   :  { %200 = vmatpush.msra.mxu1 %v199_v38  ;;  %286 = vmatpush.msra.mxu2 %v3265_v58  ;;  %v217_v38 = vand.u32 4294901760, %v216_v53  ;;  %v3364_v53 = vand.u32 4294901760, %v99_v54  ;;  %v497_v37 = vsub.f32 %v3310_v41, %v5209_v21  ;;  %v229_v21 = vand.u32 4294901760, %v228_v13  ;;  %v93_v13 = vld [vmem:[#allocation5 + $0x68] sm:$0xff] }
  0x2d   :  { %135 = vmatpush.msra.mxu0 %v3247_v47  ;;  %331 = vmatpush.msra.mxu3 %v3247_v47 }
  0x2e   :  { %206 = vmatpush.msra.mxu1 %v205_v48  ;;  %289 = vmatpush.msra.mxu2 %v3272_v61  ;;  %v234_v48 = vsub.f32 %v3301_v35, %v5208_v1  ;;  %v3380_v1 = vsub.f32 %v101_v0, %v3348_v6  ;;  %v246_v0 = vsub.f32 %v3336_v8, %v5217_v44  ;;  %v498_v40 = vand.u32 4294901760, %v497_v37  ;;  %v91_v44 = vld [vmem:[#allocation5 + $0x58] sm:$0xff] }
  0x2f   :  { %137 = vmatpush.msra.mxu0 %v3267_v59  ;;  %333 = vmatpush.msra.mxu3 %v3267_v59  ;;  %v5308_v37 = vand.u32 4294901760, %v3356_v51 }
  0x30   :  { %212 = vmatpush.msra.mxu1 %v211_v63  ;;  %292 = vmatpush.msra.mxu2 %v3293_v30  ;;  %v240_v63 = vsub.f32 %v3317_v49, %v5214_v34  ;;  %v235_v22 = vand.u32 4294901760, %v234_v48  ;;  %v509_v34 = vsub.f32 %v3341_v29, %v5218_v27  ;;  %v3412_v48 = vsub.f32 %v97_v33, %v3387_v23 }
  0x31   :  { %139 = vmatpush.msra.mxu0 %v3274_v62  ;;  %335 = vmatpush.msra.mxu3 %v3274_v62  ;;  %v515_v27 = vsub.f32 %v3356_v51, %v5308_v37  ;;  %v3414_v29 = vand.u32 4294901760, %v93_v13  ;;  %v3424_v33 = vsub.f32 %v95_v60, %v3402_v24  ;;  %v3426_v51 = vand.u32 4294901760, %v91_v44 }
  0x32   :  { %218 = vmatpush.msra.mxu1 %v217_v38  ;;  %295 = vmatpush.msra.mxu2 %v3301_v35  ;;  %v3395_v38 = vsub.f32 %v99_v54, %v3364_v53  ;;  %v241_v56 = vand.u32 4294901760, %v240_v63  ;;  %v5309_v63 = vand.u32 4294901760, %v3176_v14  ;;  %v247_v54 = vand.u32 4294901760, %v246_v0 }
  0x33   :  { %141 = vmatpush.msra.mxu0 %v3288_v12  ;;  %337 = vmatpush.msra.mxu3 %v3288_v12  ;;  %v5310_v12 = vand.u32 4294901760, %v3372_v26  ;;  %v5311_v14 = vand.u32 4294901760, %v3179_v15  ;;  %v5312_v0 = vand.u32 4294901760, %v3380_v1  ;;  %v3436_v60 = vsub.f32 %v93_v13, %v3414_v29 }
  0x34   :  { %224 = vmatpush.msra.mxu1 %v223_v55  ;;  %298 = vmatpush.msra.mxu2 %v3317_v49  ;;  %v504_v55 = vand.u32 4294901760, %v503_v50  ;;  %v510_v50 = vand.u32 4294901760, %v509_v34  ;;  %v516_v34 = vand.u32 4294901760, %v515_v27  ;;  %v5313_v15 = vand.u32 4294901760, %v3183_v16 }
  0x35   :  { %143 = vmatpush.msra.mxu0 %v3303_v36  ;;  %339 = vmatpush.msra.mxu3 %v3303_v36  ;;  %v89_v36 = vld [vmem:[#allocation5 + $0x48] sm:$0xff]  ;;  %v521_v37 = vsub.f32 %v3372_v26, %v5310_v12  ;;  %v3448_v13 = vsub.f32 %v91_v44, %v3426_v51  ;;  %v5314_v16 = vand.u32 4294901760, %v3188_v18  ;;  %v83_v12 = vld [vmem:[#allocation5 + $0x18] sm:$0xff] }
  0x36   :  { %230 = vmatpush.msra.mxu1 %v229_v21  ;;  %301 = vmatpush.msra.mxu2 %v3336_v8  ;;  %v5225_v21 = vand.u32 4294901760, %v3395_v38 }
  0x37   :  { %350 = vmatpush.msrb.mxu0 %v5309_v63  ;;  %499 = vmatpush.msrb.mxu3 %v498_v40  ;;  %v87_v40 = vld [vmem:[#allocation5 + $0x38] sm:$0xff]  ;;  %v3438_v63 = vand.u32 4294901760, %v89_v36  ;;  %v522_v27 = vand.u32 4294901760, %v521_v37  ;;  %v550_v37 = vand.u32 4294901760, %v3436_v60 }
  0x38   :  { %454 = vmatpush.msrb.mxu2 %v3281_v7  ;;  %236 = vmatpush.msra.mxu1 %v235_v22  ;;  %v527_v22 = vsub.f32 %v3380_v1, %v5312_v0  ;;  %v85_v0 = vld [vmem:[#allocation5 + $0x28] sm:$0xff] }
  0x39   :  { %354 = vmatpush.msrb.mxu0 %v5311_v14  ;;  %505 = vmatpush.msrb.mxu3 %v504_v55  ;;  %v533_v14 = vsub.f32 %v3395_v38, %v5225_v21  ;;  %v3450_v55 = vand.u32 4294901760, %v87_v40  ;;  %v3461_v44 = vsub.f32 %v89_v36, %v3438_v63  ;;  %v3463_v21 = vand.u32 4294901760, %v85_v0 }
  0x3a   :  { %456 = vmatpush.msrb.mxu2 %v3295_v31  ;;  %242 = vmatpush.msra.mxu1 %v241_v56  ;;  %v544_v56 = vand.u32 4294901760, %v3424_v33 }
  0x3b   :  { %358 = vmatpush.msrb.mxu0 %v5313_v15  ;;  %511 = vmatpush.msrb.mxu3 %v510_v50  ;;  %v528_v15 = vand.u32 4294901760, %v527_v22  ;;  %v534_v18 = vand.u32 4294901760, %v533_v14  ;;  %v3474_v36 = vsub.f32 %v87_v40, %v3450_v55  ;;  %v551_v14 = vsub.f32 %v3436_v60, %v550_v37 }
  0x3c   :  { %458 = vmatpush.msrb.mxu2 %v3312_v43  ;;  %248 = vmatpush.msra.mxu1 %v247_v54  ;;  %v5315_v54 = vand.u32 4294901760, %v3412_v48  ;;  %v545_v22 = vsub.f32 %v3424_v33, %v544_v56  ;;  %v3487_v40 = vsub.f32 %v85_v0, %v3463_v21 }
  0x3d   :  { %362 = vmatpush.msrb.mxu0 %v5314_v16  ;;  %517 = vmatpush.msrb.mxu3 %v516_v34  ;;  %v556_v34 = vand.u32 4294901760, %v3448_v13  ;;  %v3476_v16 = vand.u32 4294901760, %v83_v12 }
  0x3e   :  { %417 = vmatpush.msrb.mxu1 %v3162_v3  ;;  %460 = vmatpush.msrb.mxu2 %v3327_v57  ;;  %v539_v50 = vsub.f32 %v3412_v48, %v5315_v54  ;;  %v5316_v3 = vand.u32 4294901760, %v3191_v19  ;;  %v79_v54 = vld [vmem:[#allocation2] sm:$0xff] }
  0x3f   :  { %523 = vmatpush.msrb.mxu3 %v522_v27  ;;  %v562_v27 = vand.u32 4294901760, %v3461_v44  ;;  %v3500_v0 = vsub.f32 %v83_v12, %v3476_v16  ;;  %v5320_v12 = vand.u32 4294901760, %v3237_v42 }
  0x40   :  { %419 = vmatpush.msrb.mxu1 %v3164_v4  ;;  %366 = vmatpush.msrb.mxu0 %v5316_v3  ;;  %v5317_v4 = vand.u32 4294901760, %v3194_v20  ;;  %v540_v19 = vand.u32 4294901760, %v539_v50  ;;  %v3492_v20 = vand.u32 4294901760, %v79_v54  ;;  %v81_v3 = vld [vmem:[#allocation5 + $0x8] sm:$0xff]  ;;  %v557_v50 = vsub.f32 %v3448_v13, %v556_v34 }
  0x41   :  { %462 = vmatpush.msrb.mxu2 %v3343_v2  ;;  %529 = vmatpush.msrb.mxu3 %v528_v15  ;;  %v546_v15 = vand.u32 4294901760, %v545_v22  ;;  %v574_v22 = vand.u32 4294901760, %v3487_v40 }
  0x42   :  { %421 = vmatpush.msrb.mxu1 %v3166_v5  ;;  %370 = vmatpush.msrb.mxu0 %v5317_v4  ;;  %v5318_v5 = vand.u32 4294901760, %v3207_v28  ;;  %v568_v4 = vand.u32 4294901760, %v3474_v36  ;;  %v552_v28 = vand.u32 4294901760, %v551_v14  ;;  %v580_v14 = vand.u32 4294901760, %v3500_v0 }
  0x43   :  { %464 = vmatpush.msrb.mxu2 %v3348_v6  ;;  %535 = vmatpush.msrb.mxu3 %v534_v18  ;;  %v563_v18 = vsub.f32 %v3461_v44, %v562_v27 }
  0x44   :  { %423 = vmatpush.msrb.mxu1 %v3168_v9  ;;  %374 = vmatpush.msrb.mxu0 %v5318_v5  ;;  %v5319_v9 = vand.u32 4294901760, %v3230_v39  ;;  %v3510_v5 = vand.u32 4294901760, %v81_v3  ;;  %v558_v39 = vand.u32 4294901760, %v557_v50  ;;  %v5322_v50 = vand.u32 4294901760, %v3265_v58 }
  0x45   :  { %466 = vmatpush.msrb.mxu2 %v3364_v53  ;;  %541 = vmatpush.msrb.mxu3 %v540_v19  ;;  %v569_v19 = vsub.f32 %v3474_v36, %v568_v4  ;;  %v564_v42 = vand.u32 4294901760, %v563_v18 }
  0x46   :  { %425 = vmatpush.msrb.mxu1 %v3170_v10  ;;  %378 = vmatpush.msrb.mxu0 %v5319_v9  ;;  %v3516_v10 = vsub.f32 %v79_v54, %v3492_v20  ;;  %v575_v54 = vsub.f32 %v3487_v40, %v574_v22  ;;  %v581_v9 = vsub.f32 %v3500_v0, %v580_v14 }
  0x47   :  { %468 = vmatpush.msrb.mxu2 %v3387_v23  ;;  %547 = vmatpush.msrb.mxu3 %v546_v15  ;;  %v3531_v15 = vsub.f32 %v81_v3, %v3510_v5  ;;  %v5323_v3 = vand.u32 4294901760, %v3272_v61  ;;  %v5325_v61 = vand.u32 4294901760, %v3301_v35 }
  0x48   :  { %427 = vmatpush.msrb.mxu1 %v3172_v11  ;;  %382 = vmatpush.msrb.mxu0 %v5320_v12  ;;  %v5321_v11 = vand.u32 4294901760, %v3255_v52  ;;  %v570_v52 = vand.u32 4294901760, %v569_v19  ;;  %v5335_v19 = vld [vmem:[#allocation19_spill] sm:$0xff] }
  0x49   :  { %470 = vmatpush.msrb.mxu2 %v3402_v24  ;;  %553 = vmatpush.msrb.mxu3 %v552_v28  ;;  %v586_v58 = vand.u32 4294901760, %v3531_v15  ;;  %v5324_v28 = vand.u32 4294901760, %v3293_v30  ;;  %v5326_v30 = vand.u32 4294901760, %v3317_v49  ;;  %v5330_v49 = vld [vmem:[#allocation17_spill] sm:$0xff] }
  0x4a   :  { %429 = vmatpush.msrb.mxu1 %v3185_v17  ;;  %386 = vmatpush.msrb.mxu0 %v5321_v11  ;;  %v3537_v17 = vand.u32 4294901760, %v3516_v10  ;;  %v5336_v11 = vand.u32 4294901760, %v5335_v19 }
  0x4b   :  { %472 = vmatpush.msrb.mxu2 %v3414_v29  ;;  %559 = vmatpush.msrb.mxu3 %v558_v39  ;;  %v5333_v39 = vld [vmem:[#allocation18_spill] sm:$0xff] }
  0x4c   :  { %431 = vmatpush.msrb.mxu1 %v3201_v25  ;;  %390 = vmatpush.msrb.mxu0 %v5322_v50  ;;  %v576_v25 = vand.u32 4294901760, %v575_v54  ;;  %v147_v18 = vsub.f32 %v3516_v10, %v3537_v17 }
  0x4d   :  { %474 = vmatpush.msrb.mxu2 %v3426_v51  ;;  %565 = vmatpush.msrb.mxu3 %v564_v42 }
  0x4e   :  { %433 = vmatpush.msrb.mxu1 %v3220_v32  ;;  %394 = vmatpush.msrb.mxu0 %v5323_v3  ;;  %v582_v32 = vand.u32 4294901760, %v581_v9  ;;  %v3564_v12 = vand.u32 4294901760, %v147_v18 }
  0x4f   :  { %476 = vmatpush.msrb.mxu2 %v3438_v63  ;;  %571 = vmatpush.msrb.mxu3 %v570_v52 }
  0x50   :  { %435 = vmatpush.msrb.mxu1 %v3241_v45  ;;  %398 = vmatpush.msrb.mxu0 %v5324_v28  ;;  %v587_v45 = vsub.f32 %v3531_v15, %v586_v58 }
  0x51   :  { %478 = vmatpush.msrb.mxu2 %v3450_v55  ;;  %577 = vmatpush.msrb.mxu3 %v576_v25 }
  0x52   :  { %437 = vmatpush.msrb.mxu1 %v3243_v46  ;;  %402 = vmatpush.msrb.mxu0 %v5325_v61  ;;  %v5327_v46 = vand.u32 4294901760, %v3336_v8  ;;  %v588_v35 = vand.u32 4294901760, %v587_v45  ;;  %v5331_v8 = vand.u32 4294901760, %v5330_v49  ;;  %v802_v61 = vld [vmem:[#allocation7 + $0x40] sm:$0xff] }
  0x53   :  { %480 = vmatpush.msrb.mxu2 %v3463_v21  ;;  %583 = vmatpush.msrb.mxu3 %v582_v32 }
  0x54   :  { %439 = vmatpush.msrb.mxu1 %v3247_v47  ;;  %406 = vmatpush.msrb.mxu0 %v5326_v30  ;;  %v5328_v47 = vand.u32 4294901760, %v3310_v41 }
  0x55   :  { %482 = vmatpush.msrb.mxu2 %v3476_v16  ;;  %149 = vmatmul.f32.vlgmr.msra.gmra.mxu0 %v3564_v12 }
  0x56   :  { %441 = vmatpush.msrb.mxu1 %v3267_v59  ;;  %304 = vmatmul.f32.vlgmr.msra.gmra.mxu2 %v3516_v10  ;;  %v5329_v59 = vld [vmem:[#allocation15_spill] sm:$0xff] }
  0x57   :  { %410 = vmatpush.msrb.mxu0 %v5327_v46  ;;  %484 = vmatpush.msrb.mxu2 %v3510_v5 }
  0x58   :  { %443 = vmatpush.msrb.mxu1 %v3274_v62  ;;  %343 = vmatmul.f32.vlgmr.msra.gmra.mxu3 %v3537_v17  ;;  %v5332_v62 = vld [vmem:[#allocation16_spill] sm:$0xff] }
  0x59   :  { %597 = vmatpush.msra.mxu0 %v3310_v41  ;;  %691 = vmatpush.msra.mxu2 %v5328_v47  ;;  %v5334_v41 = vand.u32 4294901760, %v5333_v39 }
  0x5a   :  { %445 = vmatpush.msrb.mxu1 %v5329_v59  ;;  %589 = vmatpush.msrb.mxu3 %v588_v35  ;;  %v800_v59 = vld [vmem:[#allocation7 + $0x30] sm:$0xff] }
  0x5b   :  { %250 = vmatmul.f32.vlgmr.msra.gmra.mxu1 %v3492_v20  ;;  %600 = vmatpush.msra.mxu0 %v5330_v49 }
  0x5c   :  { %695 = vmatpush.msra.mxu2 %v5331_v8  ;;  %758 = vmatpush.msra.mxu3 %v3281_v7 }
  0x5d   :  { %447 = vmatpush.msrb.mxu1 %v5332_v62  ;;  %603 = vmatpush.msra.mxu0 %v5333_v39  ;;  %v3753_v39 = vand.u32 4294901760, %v802_v61 }
  0x5e   :  { %699 = vmatpush.msra.mxu2 %v5334_v41  ;;  %760 = vmatpush.msra.mxu3 %v3295_v31 }
  0x5f   :  { %650 = vmatpush.msra.mxu1 %v3281_v7  ;;  %606 = vmatpush.msra.mxu0 %v5335_v19  ;;  %v5337_v7 = vand.u32 4294901760, %v3372_v26  ;;  %v798_v19 = vld [vmem:[#allocation7 + $0x20] sm:$0xff] }
  0x60   :  { %703 = vmatpush.msra.mxu2 %v5336_v11  ;;  %762 = vmatpush.msra.mxu3 %v3312_v43 }
  0x61   :  { %652 = vmatpush.msra.mxu1 %v3295_v31  ;;  %412 = vmatmul.f32.vlgmr.msrb.gmra.mxu0 %v3492_v20  ;;  %v5338_v31 = vand.u32 4294901760, %v3380_v1 }
  0x62   :  { %609 = vmatpush.msra.mxu0 %v3372_v26  ;;  %707 = vmatpush.msra.mxu2 %v5337_v7  ;;  %v5339_v26 = vand.u32 4294901760, %v3395_v38 }
  0x63   :  { %654 = vmatpush.msra.mxu1 %v3312_v43  ;;  %764 = vmatpush.msra.mxu3 %v3327_v57  ;;  %v824_v43 = vld [vmem:[#allocation7 + $0xf0] sm:$0xff] }
  0x64   :  { %449 = vmatmul.f32.vlgmr.msrb.gmra.mxu1 %v3492_v20  ;;  %612 = vmatpush.msra.mxu0 %v3380_v1  ;;  %v822_v1 = vld [vmem:[#allocation7 + $0xe0] sm:$0xff] }
  0x65   :  { %656 = vmatpush.msra.mxu1 %v3327_v57  ;;  %711 = vmatpush.msra.mxu2 %v5338_v31  ;;  %v5340_v57 = vand.u32 4294901760, %v3412_v48 }
  0x66   :  { %766 = vmatpush.msra.mxu3 %v3343_v2  ;;  %615 = vmatpush.msra.mxu0 %v3395_v38 }
  0x67   :  { %658 = vmatpush.msra.mxu1 %v3343_v2  ;;  %715 = vmatpush.msra.mxu2 %v5339_v26  ;;  %v3622_v2 = vand.u32 4294901760, %v824_v43  ;;  %v3765_v26 = vand.u32 4294901760, %v800_v59 }
  0x68   :  { %768 = vmatpush.msra.mxu3 %v3348_v6  ;;  %618 = vmatpush.msra.mxu0 %v3412_v48  ;;  %v816_v48 = vld [vmem:[#allocation7 + $0xb0] sm:$0xff] }
  0x69   :  { %660 = vmatpush.msra.mxu1 %v3348_v6  ;;  %719 = vmatpush.msra.mxu2 %v5340_v57  ;;  %v3631_v6 = vand.u32 4294901760, %v822_v1  ;;  %v3637_v38 = vsub.f32 %v824_v43, %v3622_v2 }
  0x6a   :  { %770 = vmatpush.msra.mxu3 %v3364_v53  ;;  %621 = vmatpush.msra.mxu0 %v3424_v33 }
  0x6b   :  { %662 = vmatpush.msra.mxu1 %v3364_v53  ;;  %723 = vmatpush.msra.mxu2 %v544_v56  ;;  %v820_v53 = vld [vmem:[#allocation7 + $0xd0] sm:$0xff]  ;;  %v3649_v33 = vsub.f32 %v822_v1, %v3631_v6  ;;  %v3659_v56 = vand.u32 4294901760, %v816_v48 }
  0x6c   :  { %772 = vmatpush.msra.mxu3 %v3387_v23  ;;  %624 = vmatpush.msra.mxu0 %v3436_v60 }
  0x6d   :  { %664 = vmatpush.msra.mxu1 %v3387_v23  ;;  %727 = vmatpush.msra.mxu2 %v550_v37  ;;  %v818_v23 = vld [vmem:[#allocation7 + $0xc0] sm:$0xff]  ;;  %v5240_v37 = vand.u32 4294901760, %v3649_v33 }
  0x6e   :  { %774 = vmatpush.msra.mxu3 %v3402_v24  ;;  %627 = vmatpush.msra.mxu0 %v3448_v13  ;;  %v3655_v60 = vand.u32 4294901760, %v818_v23  ;;  %v814_v13 = vld [vmem:[#allocation7 + $0xa0] sm:$0xff] }
  0x6f   :  { %666 = vmatpush.msra.mxu1 %v3402_v24  ;;  %731 = vmatpush.msra.mxu2 %v556_v34  ;;  %v3644_v24 = vand.u32 4294901760, %v820_v53 }
  0x70   :  { %776 = vmatpush.msra.mxu3 %v3414_v29  ;;  %630 = vmatpush.msra.mxu0 %v3461_v44  ;;  %v812_v44 = vld [vmem:[#allocation7 + $0x90] sm:$0xff]  ;;  %v3677_v34 = vsub.f32 %v818_v23, %v3655_v60  ;;  %v3777_v23 = vand.u32 4294901760, %v798_v19 }
  0x71   :  { %668 = vmatpush.msra.mxu1 %v3414_v29  ;;  %735 = vmatpush.msra.mxu2 %v562_v27  ;;  %v5242_v29 = vand.u32 4294901760, %v3637_v38  ;;  %v810_v27 = vld [vmem:[#allocation7 + $0x80] sm:$0xff] }
  0x72   :  { %778 = vmatpush.msra.mxu3 %v3426_v51  ;;  %633 = vmatpush.msra.mxu0 %v3474_v36  ;;  %v3679_v36 = vand.u32 4294901760, %v814_v13  ;;  %v3703_v54 = vand.u32 4294901760, %v810_v27 }
  0x73   :  { %670 = vmatpush.msra.mxu1 %v3426_v51  ;;  %739 = vmatpush.msra.mxu2 %v568_v4  ;;  %v3665_v51 = vsub.f32 %v820_v53, %v3644_v24  ;;  %v3690_v4 = vand.u32 4294901760, %v812_v44  ;;  %v3775_v53 = vsub.f32 %v802_v61, %v3753_v39 }
  0x74   :  { %780 = vmatpush.msra.mxu3 %v3438_v63  ;;  %636 = vmatpush.msra.mxu0 %v3487_v40  ;;  %v3701_v42 = vsub.f32 %v814_v13, %v3679_v36  ;;  %v3728_v32 = vsub.f32 %v810_v27, %v3703_v54  ;;  %v825_v13 = vld [vmem:[#allocation7 + $0xf8] sm:$0xff] }
  0x75   :  { %672 = vmatpush.msra.mxu1 %v3438_v63  ;;  %743 = vmatpush.msra.mxu2 %v574_v22  ;;  %v870_v63 = vsub.f32 %v3637_v38, %v5242_v29  ;;  %v5237_v40 = vand.u32 4294901760, %v3665_v51  ;;  %v808_v22 = vld [vmem:[#allocation7 + $0x70] sm:$0xff]  ;;  %v3714_v9 = vsub.f32 %v812_v44, %v3690_v4 }
  0x76   :  { %782 = vmatpush.msra.mxu3 %v3450_v55  ;;  %639 = vmatpush.msra.mxu0 %v3500_v0  ;;  %v876_v0 = vsub.f32 %v3649_v33, %v5240_v37  ;;  %v3716_v3 = vand.u32 4294901760, %v808_v22  ;;  %v5234_v18 = vand.u32 4294901760, %v3701_v42  ;;  %v5231_v62 = vand.u32 4294901760, %v3728_v32 }
  0x77   :  { %674 = vmatpush.msra.mxu1 %v3450_v55  ;;  %747 = vmatpush.msra.mxu2 %v580_v14  ;;  %v3684_v55 = vsub.f32 %v816_v48, %v3659_v56  ;;  %v5236_v14 = vand.u32 4294901760, %v3677_v34  ;;  %v882_v52 = vsub.f32 %v3665_v51, %v5237_v40  ;;  %v5232_v30 = vand.u32 4294901760, %v3714_v9  ;;  %v796_v48 = vld [vmem:[#allocation7 + $0x10] sm:$0xff]  ;;  %v811_v40 = vld [vmem:[#allocation7 + $0x88] sm:$0xff] }
  0x78   :  { %784 = vmatpush.msra.mxu3 %v3463_v21  ;;  %490 = vmatmul.f32.vlgmr.msrb.gmra.mxu2 %v3564_v12  ;;  %v3739_v46 = vsub.f32 %v808_v22, %v3716_v3  ;;  %v900_v8 = vsub.f32 %v3701_v42, %v5234_v18  ;;  %v912_v1 = vsub.f32 %v3728_v32, %v5231_v62  ;;  %v794_v22 = vld [vmem:[#allocation7] sm:$0xff]  ;;  %v3896_v29 = vand.u32 4294901760, %v811_v40 }
  0x79   :  { %642 = vmatpush.msra.mxu0 %v3531_v15  ;;  %676 = vmatpush.msra.mxu1 %v3463_v21  ;;  %v871_v21 = vand.u32 4294901760, %v870_v63  ;;  %v806_v15 = vld [vmem:[#allocation7 + $0x60] sm:$0xff]  ;;  %v5235_v50 = vand.u32 4294901760, %v3684_v55  ;;  %v888_v28 = vsub.f32 %v3677_v34, %v5236_v14  ;;  %v883_v45 = vand.u32 4294901760, %v882_v52  ;;  %v823_v52 = vld [vmem:[#allocation7 + $0xe8] sm:$0xff] }
  0x7a   :  { %751 = vmatpush.msra.mxu2 %v586_v58  ;;  %786 = vmatpush.msra.mxu3 %v3476_v16  ;;  %v3720_v25 = vand.u32 4294901760, %v806_v15  ;;  %v804_v58 = vld [vmem:[#allocation7 + $0x50] sm:$0xff]  ;;  %v906_v11 = vsub.f32 %v3714_v9, %v5232_v30  ;;  %v5230_v7 = vand.u32 4294901760, %v3739_v46  ;;  %v901_v57 = vand.u32 4294901760, %v900_v8 }
  0x7b   :  { %827 = vmatpush.msrb.mxu0 %v3622_v2  ;;  %591 = vmatmul.f32.vlgmr.msrb.gmra.mxu3 %v3492_v20  ;;  %v3741_v35 = vand.u32 4294901760, %v804_v58  ;;  %v889_v49 = vand.u32 4294901760, %v888_v28  ;;  %v3799_v28 = vsub.f32 %v798_v19, %v3777_v23  ;;  %v3805_v61 = vand.u32 4294901760, %v794_v22 }
  0x7c   :  { %970 = vmatpush.msrb.mxu2 %v3637_v38  ;;  %678 = vmatpush.msra.mxu1 %v3476_v16  ;;  %v877_v16 = vand.u32 4294901760, %v876_v0  ;;  %v3745_v47 = vsub.f32 %v806_v15, %v3720_v25  ;;  %v907_v44 = vand.u32 4294901760, %v906_v11  ;;  %v918_v63 = vsub.f32 %v3739_v46, %v5230_v7  ;;  %v815_v7 = vld [vmem:[#allocation7 + $0xa8] sm:$0xff] }
  0x7d   :  { %788 = vmatpush.msra.mxu3 %v3510_v5  ;;  %829 = vmatpush.msrb.mxu0 %v3631_v6  ;;  %v3763_v31 = vsub.f32 %v804_v58, %v3741_v35  ;;  %v3787_v0 = vsub.f32 %v800_v59, %v3765_v26  ;;  %v3794_v15 = vand.u32 4294901760, %v796_v48  ;;  %v5227_v58 = vand.u32 4294901760, %v3775_v53 }
  0x7e   :  { %973 = vmatpush.msrb.mxu2 %v3649_v33  ;;  %680 = vmatpush.msra.mxu1 %v3510_v5  ;;  %v894_v5 = vsub.f32 %v3684_v55, %v5235_v50  ;;  %v5228_v43 = vand.u32 4294901760, %v3745_v47  ;;  %v919_v59 = vand.u32 4294901760, %v918_v63  ;;  %v3869_v50 = vand.u32 4294901760, %v815_v7 }
  0x7f   :  { %1023 = vmatpush.msrb.mxu3 %v3622_v2  ;;  %831 = vmatpush.msrb.mxu0 %v3644_v24  ;;  %v5226_v27 = vand.u32 4294901760, %v3763_v31  ;;  %5341 = vst [vmem:[#allocation15_spill] sm:$0xff] %v3794_v15  ;;  %v5229_v8 = vand.u32 4294901760, %v3787_v0  ;;  %v3817_v11 = vsub.f32 %v796_v48, %v3794_v15  ;;  %v3832_v48 = vsub.f32 %v794_v22, %v3805_v61 }
  0x80   :  { %872 = vmatpush.msrb.mxu1 %v871_v21  ;;  %976 = vmatpush.msrb.mxu2 %v3665_v51  ;;  %v895_v41 = vand.u32 4294901760, %v894_v5  ;;  %v924_v21 = vsub.f32 %v3745_v47, %v5228_v43  ;;  %v3801_v5 = vand.u32 4294901760, %v825_v13 }
  0x81   :  { %1025 = vmatpush.msrb.mxu3 %v3631_v6  ;;  %753 = vmatmul.f32.vlgmr.msra.gmra.mxu2 %v3492_v20  ;;  %v5238_v43 = vand.u32 4294901760, %v3817_v11  ;;  %v5241_v62 = vand.u32 4294901760, %v3832_v48 }
  0x82   :  { %833 = vmatpush.msrb.mxu0 %v3655_v60  ;;  %878 = vmatpush.msrb.mxu1 %v877_v16  ;;  %v913_v16 = vand.u32 4294901760, %v912_v1  ;;  %v925_v19 = vand.u32 4294901760, %v924_v21  ;;  %v5233_v1 = vand.u32 4294901760, %v3799_v28 }
  0x83   :  { %979 = vmatpush.msrb.mxu2 %v3677_v34  ;;  %1027 = vmatpush.msrb.mxu3 %v3644_v24 }
  0x84   :  { %645 = vmatmul.f32.vlgmr.msra.gmra.mxu0 %v3516_v10  ;;  %790 = vmatmul.f32.vlgmr.msra.gmra.mxu3 %v3492_v20 }
  0x85   :  { %835 = vmatpush.msrb.mxu0 %v3659_v56  ;;  %884 = vmatpush.msrb.mxu1 %v883_v45  ;;  %v821_v45 = vld [vmem:[#allocation7 + $0xd8] sm:$0xff] }
  0x86   :  { %982 = vmatpush.msrb.mxu2 %v3684_v55  ;;  %1029 = vmatpush.msrb.mxu3 %v3655_v60  ;;  %v3827_v63 = vand.u32 4294901760, %v821_v45 }
  0x87   :  { %684 = vmatmul.f32.vlgmr.msra.gmra.mxu1 %v3537_v17  ;;  %837 = vmatpush.msrb.mxu0 %v3679_v36 }
  0x88   :  { %890 = vmatpush.msrb.mxu1 %v889_v49  ;;  %985 = vmatpush.msrb.mxu2 %v3701_v42  ;;  %v930_v49 = vsub.f32 %v3763_v31, %v5226_v27  ;;  %v819_v27 = vld [vmem:[#allocation7 + $0xc8] sm:$0xff] }
  0x89   :  { %1031 = vmatpush.msrb.mxu3 %v3659_v56  ;;  %839 = vmatpush.msrb.mxu0 %v3690_v4  ;;  %v3844_v22 = vand.u32 4294901760, %v819_v27 }
  0x8a   :  { %896 = vmatpush.msrb.mxu1 %v895_v41  ;;  %988 = vmatpush.msrb.mxu2 %v3714_v9  ;;  %v3812_v41 = vand.u32 4294901760, %v823_v52  ;;  %v931_v21 = vand.u32 4294901760, %v930_v49  ;;  %v948_v49 = vsub.f32 %v3799_v28, %v5233_v1  ;;  %v813_v1 = vld [vmem:[#allocation7 + $0x98] sm:$0xff] }
  0x8b   :  { %1033 = vmatpush.msrb.mxu3 %v3679_v36  ;;  %841 = vmatpush.msrb.mxu0 %v3703_v54  ;;  %v3867_v18 = vsub.f32 %v819_v27, %v3844_v22  ;;  %v960_v27 = vsub.f32 %v3832_v48, %v5241_v62 }
  0x8c   :  { %902 = vmatpush.msrb.mxu1 %v901_v57  ;;  %991 = vmatpush.msrb.mxu2 %v3728_v32  ;;  %v936_v57 = vsub.f32 %v3775_v53, %v5227_v58  ;;  %v817_v58 = vld [vmem:[#allocation7 + $0xb8] sm:$0xff] }
  0x8d   :  { %1035 = vmatpush.msrb.mxu3 %v3690_v4  ;;  %843 = vmatpush.msrb.mxu0 %v3716_v3  ;;  %v3857_v30 = vand.u32 4294901760, %v817_v58  ;;  %5345 = vst [vmem:[#allocation19_spill] sm:$0xff] %v3867_v18 }
  0x8e   :  { %908 = vmatpush.msrb.mxu1 %v907_v44  ;;  %994 = vmatpush.msrb.mxu2 %v3739_v46  ;;  %v3825_v44 = vsub.f32 %v825_v13, %v3801_v5  ;;  %v3839_v13 = vsub.f32 %v823_v52, %v3812_v41 }
  0x8f   :  { %1037 = vmatpush.msrb.mxu3 %v3703_v54  ;;  %845 = vmatpush.msrb.mxu0 %v3720_v25 }
  0x90   :  { %914 = vmatpush.msrb.mxu1 %v913_v16  ;;  %5342 = vst [vmem:[#allocation17_spill] sm:$0xff] %v3825_v44  ;;  %997 = vmatpush.msrb.mxu2 %v3745_v47  ;;  %v942_v16 = vsub.f32 %v3787_v0, %v5229_v8  ;;  %v5239_v52 = vand.u32 4294901760, %v3825_v44  ;;  %v3852_v8 = vsub.f32 %v821_v45, %v3827_v63 }
  0x91   :  { %1039 = vmatpush.msrb.mxu3 %v3716_v3  ;;  %847 = vmatpush.msrb.mxu0 %v3741_v35  ;;  %5343 = vst [vmem:[#allocation16_spill] sm:$0xff] %v3839_v13  ;;  %v954_v45 = vsub.f32 %v3817_v11, %v5238_v43  ;;  %v3882_v43 = vsub.f32 %v817_v58, %v3857_v30 }
  0x92   :  { %920 = vmatpush.msrb.mxu1 %v919_v59  ;;  %1000 = vmatpush.msrb.mxu2 %v3763_v31  ;;  %v937_v59 = vand.u32 4294901760, %v936_v57  ;;  %5344 = vst [vmem:[#allocation18_spill] sm:$0xff] %v3852_v8  ;;  %v5243_v57 = vand.u32 4294901760, %v3839_v13  ;;  %v5248_v14 = vand.u32 4294901760, %v3852_v8  ;;  %v3894_v58 = vsub.f32 %v815_v7, %v3869_v50 }
  0x93   :  { %1041 = vmatpush.msrb.mxu3 %v3720_v25  ;;  %849 = vmatpush.msrb.mxu0 %v3753_v39  ;;  %v955_v37 = vand.u32 4294901760, %v954_v45  ;;  %v961_v45 = vand.u32 4294901760, %v960_v27 }
  0x94   :  { %926 = vmatpush.msrb.mxu1 %v925_v19  ;;  %1003 = vmatpush.msrb.mxu2 %v3775_v53  ;;  %v943_v19 = vand.u32 4294901760, %v942_v16  ;;  %v1211_v16 = vsub.f32 %v3825_v44, %v5239_v52  ;;  %v809_v52 = vld [vmem:[#allocation7 + $0x78] sm:$0xff] }
  0x95   :  { %1043 = vmatpush.msrb.mxu3 %v3741_v35  ;;  %851 = vmatpush.msrb.mxu0 %v3765_v26  ;;  %v3908_v44 = vand.u32 4294901760, %v809_v52 }
  0x96   :  { %932 = vmatpush.msrb.mxu1 %v931_v21  ;;  %1006 = vmatpush.msrb.mxu2 %v3787_v0  ;;  %v949_v21 = vand.u32 4294901760, %v948_v49  ;;  %v1217_v49 = vsub.f32 %v3839_v13, %v5243_v57  ;;  %v1223_v57 = vsub.f32 %v3852_v8, %v5248_v14  ;;  %v807_v13 = vld [vmem:[#allocation7 + $0x68] sm:$0xff]  ;;  %v805_v14 = vld [vmem:[#allocation7 + $0x58] sm:$0xff]  ;;  %v5347_v8 = vand.u32 4294901760, %v3867_v18 }
  0x97   :  { %1045 = vmatpush.msrb.mxu3 %v3753_v39  ;;  %853 = vmatpush.msrb.mxu0 %v3777_v23  ;;  %v3931_v62 = vsub.f32 %v809_v52, %v3908_v44 }
  0x98   :  { %938 = vmatpush.msrb.mxu1 %v937_v59  ;;  %1009 = vmatpush.msrb.mxu2 %v3799_v28  ;;  %v3884_v59 = vand.u32 4294901760, %v813_v1  ;;  %v1229_v27 = vsub.f32 %v3867_v18, %v5347_v8  ;;  %v803_v18 = vld [vmem:[#allocation7 + $0x48] sm:$0xff] }
  0x99   :  { %1047 = vmatpush.msrb.mxu3 %v3765_v26  ;;  %855 = vmatpush.msrb.mxu0 %v3794_v15 }
  0x9a   :  { %944 = vmatpush.msrb.mxu1 %v943_v19  ;;  %1012 = vmatpush.msrb.mxu2 %v3817_v11  ;;  %v1212_v19 = vand.u32 4294901760, %v1211_v16  ;;  %v3906_v7 = vsub.f32 %v813_v1, %v3884_v59  ;;  %v1218_v16 = vand.u32 4294901760, %v1217_v49  ;;  %v3919_v1 = vsub.f32 %v811_v40, %v3896_v29 }
  0x9b   :  { %1049 = vmatpush.msrb.mxu3 %v3777_v23  ;;  %857 = vmatpush.msrb.mxu0 %v3805_v61  ;;  %v1224_v49 = vand.u32 4294901760, %v1223_v57  ;;  %v3933_v40 = vand.u32 4294901760, %v805_v14  ;;  %v1230_v57 = vand.u32 4294901760, %v1229_v27 }
  0x9c   :  { %950 = vmatpush.msrb.mxu1 %v949_v21  ;;  %1015 = vmatpush.msrb.mxu2 %v3832_v48  ;;  %v5346_v21 = vand.u32 4294901760, %v3637_v38  ;;  %v5348_v38 = vand.u32 4294901760, %v3649_v33  ;;  %v1246_v8 = vand.u32 4294901760, %v3906_v7  ;;  %v5350_v33 = vand.u32 4294901760, %v3665_v51 }
  0x9d   :  { %1051 = vmatpush.msrb.mxu3 %v3794_v15  ;;  %v3921_v15 = vand.u32 4294901760, %v807_v13  ;;  %v3949_v51 = vand.u32 4294901760, %v803_v18  ;;  %1018 = vmatmul.f32.vlgmr.msrb.gmra.mxu2 %v3516_v10 }
  0x9e   :  { %1064 = vmatpush.msra.mxu0 %v5346_v21  ;;  %1168 = vmatpush.msra.mxu2 %v3801_v5  ;;  %v1247_v27 = vsub.f32 %v3906_v7, %v1246_v8 }
  0x9f   :  { %956 = vmatpush.msrb.mxu1 %v955_v37  ;;  %1053 = vmatpush.msrb.mxu3 %v3805_v61  ;;  %v5349_v37 = vand.u32 4294901760, %v3882_v43  ;;  %v3944_v52 = vsub.f32 %v807_v13, %v3921_v15  ;;  %v3957_v13 = vsub.f32 %v805_v14, %v3933_v40  ;;  %v5354_v14 = vand.u32 4294901760, %v3701_v42 }
  0xa0   :  { %1068 = vmatpush.msra.mxu0 %v5348_v38  ;;  %1170 = vmatpush.msra.mxu2 %v3812_v41  ;;  %v5254_v38 = vand.u32 4294901760, %v3919_v1  ;;  %v5355_v42 = vand.u32 4294901760, %v3714_v9 }
  0xa1   :  { %1213 = vmatpush.msra.mxu3 %v1212_v19  ;;  %962 = vmatpush.msrb.mxu1 %v961_v45  ;;  %v1235_v21 = vsub.f32 %v3882_v43, %v5349_v37  ;;  %v5351_v19 = vand.u32 4294901760, %v3894_v58  ;;  %v5352_v37 = vand.u32 4294901760, %v3677_v34  ;;  %v5353_v34 = vand.u32 4294901760, %v3684_v55  ;;  %v797_v55 = vld [vmem:[#allocation7 + $0x18] sm:$0xff] }
  0xa2   :  { %1072 = vmatpush.msra.mxu0 %v5350_v33  ;;  %1172 = vmatpush.msra.mxu2 %v3827_v63  ;;  %v5255_v33 = vand.u32 4294901760, %v3931_v62 }
  0xa3   :  { %1131 = vmatpush.msra.mxu1 %v3622_v2  ;;  %1219 = vmatpush.msra.mxu3 %v1218_v16  ;;  %v1241_v45 = vsub.f32 %v3894_v58, %v5351_v19  ;;  %v801_v2 = vld [vmem:[#allocation7 + $0x38] sm:$0xff]  ;;  %v1236_v16 = vand.u32 4294901760, %v1235_v21  ;;  %v1253_v21 = vsub.f32 %v3919_v1, %v5254_v38  ;;  %v1264_v19 = vand.u32 4294901760, %v3944_v52 }
  0xa4   :  { %1076 = vmatpush.msra.mxu0 %v5352_v37  ;;  %1174 = vmatpush.msra.mxu2 %v3844_v22  ;;  %v3967_v37 = vand.u32 4294901760, %v801_v2 }
  0xa5   :  { %1133 = vmatpush.msra.mxu1 %v3631_v6  ;;  %1225 = vmatpush.msra.mxu3 %v1224_v49  ;;  %v799_v6 = vld [vmem:[#allocation7 + $0x28] sm:$0xff]  ;;  %v1242_v49 = vand.u32 4294901760, %v1241_v45  ;;  %v1259_v45 = vsub.f32 %v3931_v62, %v5255_v33  ;;  %v5356_v33 = vand.u32 4294901760, %v3728_v32  ;;  %v5357_v32 = vand.u32 4294901760, %v3739_v46 }
  0xa6   :  { %1080 = vmatpush.msra.mxu0 %v5353_v34  ;;  %1176 = vmatpush.msra.mxu2 %v3857_v30  ;;  %v1270_v34 = vand.u32 4294901760, %v3957_v13  ;;  %v3980_v38 = vand.u32 4294901760, %v799_v6 }
  0xa7   :  { %1135 = vmatpush.msra.mxu1 %v3644_v24  ;;  %1231 = vmatpush.msra.mxu3 %v1230_v57  ;;  %v3973_v24 = vsub.f32 %v803_v18, %v3949_v51  ;;  %v1248_v57 = vand.u32 4294901760, %v1247_v27  ;;  %v1254_v18 = vand.u32 4294901760, %v1253_v21  ;;  %v3990_v27 = vsub.f32 %v801_v2, %v3967_v37 }
  0xa8   :  { %1084 = vmatpush.msra.mxu0 %v5354_v14  ;;  %1178 = vmatpush.msra.mxu2 %v3869_v50  ;;  %v3992_v14 = vand.u32 4294901760, %v797_v55  ;;  %v1260_v9 = vand.u32 4294901760, %v1259_v45  ;;  %v4003_v2 = vsub.f32 %v799_v6, %v3980_v38  ;;  %v5358_v45 = vand.u32 4294901760, %v3745_v47 }
  0xa9   :  { %1137 = vmatpush.msra.mxu1 %v3655_v60  ;;  %1237 = vmatpush.msra.mxu3 %v1236_v16  ;;  %v795_v60 = vld [vmem:[#allocation7 + $0x8] sm:$0xff]  ;;  %v1265_v16 = vsub.f32 %v3944_v52, %v1264_v19 }
  0xaa   :  { %1088 = vmatpush.msra.mxu0 %v5355_v42  ;;  %1180 = vmatpush.msra.mxu2 %v3884_v59  ;;  %v4005_v21 = vand.u32 4294901760, %v795_v60  ;;  %v1288_v6 = vand.u32 4294901760, %v4003_v2 }
  0xab   :  { %1139 = vmatpush.msra.mxu1 %v3659_v56  ;;  %1243 = vmatpush.msra.mxu3 %v1242_v49  ;;  %v1276_v56 = vand.u32 4294901760, %v3973_v24  ;;  %v1271_v49 = vsub.f32 %v3957_v13, %v1270_v34 }
  0xac   :  { %1092 = vmatpush.msra.mxu0 %v5356_v33  ;;  %1182 = vmatpush.msra.mxu2 %v3896_v29  ;;  %v1282_v33 = vand.u32 4294901760, %v3990_v27  ;;  %v4024_v42 = vsub.f32 %v795_v60, %v4005_v21 }
  0xad   :  { %1141 = vmatpush.msra.mxu1 %v3679_v36  ;;  %1249 = vmatpush.msra.mxu3 %v1248_v57  ;;  %v1266_v36 = vand.u32 4294901760, %v1265_v16  ;;  %v4013_v57 = vsub.f32 %v797_v55, %v3992_v14  ;;  %v1277_v46 = vsub.f32 %v3973_v24, %v1276_v56  ;;  %v5359_v55 = vand.u32 4294901760, %v3763_v31 }
  0xae   :  { %1096 = vmatpush.msra.mxu0 %v5357_v32  ;;  %1184 = vmatpush.msra.mxu2 %v3908_v44  ;;  %v1300_v31 = vand.u32 4294901760, %v4024_v42  ;;  %v5361_v16 = vand.u32 4294901760, %v3787_v0  ;;  %v5363_v32 = vand.u32 4294901760, %v3817_v11  ;;  %v5367_v11 = vld [vmem:[#allocation15_spill] sm:$0xff] }
  0xaf   :  { %1143 = vmatpush.msra.mxu1 %v3690_v4  ;;  %1255 = vmatpush.msra.mxu3 %v1254_v18  ;;  %v1272_v4 = vand.u32 4294901760, %v1271_v49  ;;  %v1294_v47 = vand.u32 4294901760, %v4013_v57  ;;  %v5360_v18 = vand.u32 4294901760, %v3775_v53  ;;  %v1278_v60 = vand.u32 4294901760, %v1277_v46 }
  0xb0   :  { %1100 = vmatpush.msra.mxu0 %v5358_v45  ;;  %1186 = vmatpush.msra.mxu2 %v3921_v15 }
  0xb1   :  { %1145 = vmatpush.msra.mxu1 %v3703_v54  ;;  %1261 = vmatpush.msra.mxu3 %v1260_v9  ;;  %v1283_v54 = vsub.f32 %v3990_v27, %v1282_v33  ;;  %v1295_v53 = vsub.f32 %v4013_v57, %v1294_v47  ;;  %v5362_v9 = vand.u32 4294901760, %v3799_v28 }
  0xb2   :  { %1104 = vmatpush.msra.mxu0 %v5359_v55  ;;  %1188 = vmatpush.msra.mxu2 %v3933_v40 }
  0xb3   :  { %1147 = vmatpush.msra.mxu1 %v3716_v3  ;;  %1267 = vmatpush.msra.mxu3 %v1266_v36  ;;  %v1289_v3 = vsub.f32 %v4003_v2, %v1288_v6  ;;  %v1296_v0 = vand.u32 4294901760, %v1295_v53  ;;  %v5364_v36 = vand.u32 4294901760, %v3832_v48 }
  0xb4   :  { %1108 = vmatpush.msra.mxu0 %v5360_v18  ;;  %1190 = vmatpush.msra.mxu2 %v3949_v51 }
  0xb5   :  { %1149 = vmatpush.msra.mxu1 %v3720_v25  ;;  %1273 = vmatpush.msra.mxu3 %v1272_v4  ;;  %v1284_v25 = vand.u32 4294901760, %v1283_v54  ;;  %v1290_v49 = vand.u32 4294901760, %v1289_v3  ;;  %v5372_v4 = vld [vmem:[#allocation19_spill] sm:$0xff]  ;;  %v1524_v3 = vld [vmem:[#allocation8 + $0x50] sm:$0xff] }
  0xb6   :  { %1112 = vmatpush.msra.mxu0 %v5361_v16  ;;  %1192 = vmatpush.msra.mxu2 %v3967_v37  ;;  %v5373_v55 = vand.u32 4294901760, %v5372_v4 }
  0xb7   :  { %1151 = vmatpush.msra.mxu1 %v3741_v35  ;;  %1279 = vmatpush.msra.mxu3 %v1278_v60  ;;  %v1301_v35 = vsub.f32 %v4024_v42, %v1300_v31 }
  0xb8   :  { %863 = vmatmul.f32.vlgmr.msrb.gmra.mxu0 %v3564_v12  ;;  %1057 = vmatmul.f32.vlgmr.msrb.gmra.mxu3 %v3537_v17 }
  0xb9   :  { %1116 = vmatpush.msra.mxu0 %v5362_v9  ;;  %1153 = vmatpush.msra.mxu1 %v3753_v39  ;;  %v1302_v28 = vand.u32 4294901760, %v1301_v35  ;;  %v5365_v39 = vld [vmem:[#allocation17_spill] sm:$0xff] }
  0xba   :  { %1194 = vmatpush.msra.mxu2 %v3980_v38  ;;  %1285 = vmatpush.msra.mxu3 %v1284_v25  ;;  %v5366_v45 = vand.u32 4294901760, %v5365_v39 }
  0xbb   :  { %964 = vmatmul.f32.vlgmr.msrb.gmra.mxu1 %v3492_v20  ;;  %1120 = vmatpush.msra.mxu0 %v5363_v32  ;;  %v1522_v32 = vld [vmem:[#allocation8 + $0x40] sm:$0xff] }
  0xbc   :  { %1155 = vmatpush.msra.mxu1 %v3765_v26  ;;  %1196 = vmatpush.msra.mxu2 %v3992_v14  ;;  %v5368_v26 = vld [vmem:[#allocation16_spill] sm:$0xff] }
  0xbd   :  { %1291 = vmatpush.msra.mxu3 %v1290_v49  ;;  %1124 = vmatpush.msra.mxu0 %v5364_v36  ;;  %v5369_v46 = vand.u32 4294901760, %v5368_v26 }
  0xbe   :  { %1157 = vmatpush.msra.mxu1 %v3777_v23  ;;  %1198 = vmatpush.msra.mxu2 %v4005_v21  ;;  %v5370_v23 = vld [vmem:[#allocation18_spill] sm:$0xff] }
  0xbf   :  { %1297 = vmatpush.msra.mxu3 %v1296_v0  ;;  %1311 = vmatpush.msrb.mxu0 %v5365_v39  ;;  %v5371_v48 = vand.u32 4294901760, %v5370_v23 }
  0xc0   :  { %1405 = vmatpush.msrb.mxu2 %v5366_v45  ;;  %1159 = vmatpush.msra.mxu1 %v5367_v11  ;;  %v4256_v45 = vand.u32 4294901760, %v1524_v3  ;;  %v1520_v11 = vld [vmem:[#allocation8 + $0x30] sm:$0xff] }
  0xc1   :  { %1303 = vmatpush.msra.mxu3 %v1302_v28  ;;  %1126 = vmatmul.f32.vlgmr.msra.gmra.mxu0 %v3492_v20 }
  0xc2   :  { %1409 = vmatpush.msrb.mxu2 %v5369_v46  ;;  %1314 = vmatpush.msrb.mxu0 %v5368_v26  ;;  %v1518_v26 = vld [vmem:[#allocation8 + $0x20] sm:$0xff]  ;;  %v1516_v46 = vld [vmem:[#allocation8 + $0x10] sm:$0xff] }
  0xc3   :  { %1472 = vmatpush.msrb.mxu3 %v3801_v5  ;;  %1161 = vmatpush.msra.mxu1 %v3805_v61  ;;  %v5374_v61 = vand.u32 4294901760, %v3882_v43 }
  0xc4   :  { %1413 = vmatpush.msrb.mxu2 %v5371_v48  ;;  %1163 = vmatmul.f32.vlgmr.msra.gmra.mxu1 %v3492_v20 }
  0xc5   :  { %1317 = vmatpush.msrb.mxu0 %v5370_v23  ;;  %1364 = vmatpush.msrb.mxu1 %v3801_v5  ;;  %v5375_v5 = vand.u32 4294901760, %v3894_v58 }
  0xc6   :  { %1474 = vmatpush.msrb.mxu3 %v3812_v41  ;;  %1417 = vmatpush.msrb.mxu2 %v5373_v55 }
  0xc7   :  { %1320 = vmatpush.msrb.mxu0 %v5372_v4  ;;  %1366 = vmatpush.msrb.mxu1 %v3812_v41  ;;  %v5377_v41 = vand.u32 4294901760, %v3931_v62 }
  0xc8   :  { %1476 = vmatpush.msrb.mxu3 %v3827_v63  ;;  %1421 = vmatpush.msrb.mxu2 %v5374_v61  ;;  %v4266_v61 = vsub.f32 %v1524_v3, %v4256_v45 }
  0xc9   :  { %1323 = vmatpush.msrb.mxu0 %v3882_v43  ;;  %1368 = vmatpush.msrb.mxu1 %v3827_v63  ;;  %v5376_v43 = vand.u32 4294901760, %v3919_v1 }
  0xca   :  { %1478 = vmatpush.msrb.mxu3 %v3844_v22  ;;  %1425 = vmatpush.msrb.mxu2 %v5375_v5  ;;  %v4268_v5 = vand.u32 4294901760, %v1522_v32 }
  0xcb   :  { %1326 = vmatpush.msrb.mxu0 %v3894_v58  ;;  %1370 = vmatpush.msrb.mxu1 %v3844_v22 }
  0xcc   :  { %1480 = vmatpush.msrb.mxu3 %v3857_v30  ;;  %1429 = vmatpush.msrb.mxu2 %v1246_v8  ;;  %v1532_v8 = vld [vmem:[#allocation8 + $0x90] sm:$0xff] }
  0xcd   :  { %1329 = vmatpush.msrb.mxu0 %v3906_v7  ;;  %1372 = vmatpush.msrb.mxu1 %v3857_v30  ;;  %v1536_v7 = vld [vmem:[#allocation8 + $0xb0] sm:$0xff] }
  0xce   :  { %1482 = vmatpush.msrb.mxu3 %v3869_v50  ;;  %1433 = vmatpush.msrb.mxu2 %v5376_v43  ;;  %v1514_v43 = vld [vmem:[#allocation8] sm:$0xff] }
  0xcf   :  { %1332 = vmatpush.msrb.mxu0 %v3919_v1  ;;  %1374 = vmatpush.msrb.mxu1 %v3869_v50  ;;  %v1542_v50 = vld [vmem:[#allocation8 + $0xe0] sm:$0xff] }
  0xd0   :  { %1484 = vmatpush.msrb.mxu3 %v3884_v59  ;;  %1437 = vmatpush.msrb.mxu2 %v5377_v41  ;;  %v1534_v1 = vld [vmem:[#allocation8 + $0xa0] sm:$0xff]  ;;  %v4271_v41 = vand.u32 4294901760, %v1520_v11 }
  0xd1   :  { %1335 = vmatpush.msrb.mxu0 %v3931_v62  ;;  %1376 = vmatpush.msrb.mxu1 %v3884_v59  ;;  %v1540_v62 = vld [vmem:[#allocation8 + $0xd0] sm:$0xff] }
  0xd2   :  { %1486 = vmatpush.msrb.mxu3 %v3896_v29  ;;  %1441 = vmatpush.msrb.mxu2 %v1264_v19 }
  0xd3   :  { %1338 = vmatpush.msrb.mxu0 %v3944_v52  ;;  %1378 = vmatpush.msrb.mxu1 %v3896_v29  ;;  %v4191_v52 = vand.u32 4294901760, %v1532_v8 }
  0xd4   :  { %1488 = vmatpush.msrb.mxu3 %v3908_v44  ;;  %1445 = vmatpush.msrb.mxu2 %v1270_v34 }
  0xd5   :  { %1341 = vmatpush.msrb.mxu0 %v3957_v13  ;;  %1380 = vmatpush.msrb.mxu1 %v3908_v44  ;;  %v4171_v44 = vand.u32 4294901760, %v1540_v62  ;;  %v1528_v13 = vld [vmem:[#allocation8 + $0x70] sm:$0xff] }
  0xd6   :  { %1490 = vmatpush.msrb.mxu3 %v3921_v15  ;;  %1449 = vmatpush.msrb.mxu2 %v1276_v56  ;;  %v4210_v56 = vsub.f32 %v1532_v8, %v4191_v52 }
  0xd7   :  { %1344 = vmatpush.msrb.mxu0 %v3973_v24  ;;  %1382 = vmatpush.msrb.mxu1 %v3921_v15  ;;  %v4181_v59 = vsub.f32 %v1540_v62, %v4171_v44  ;;  %v1576_v62 = vld [vmem:[#allocation8 + $0x1f0] sm:$0xff] }
  0xd8   :  { %1492 = vmatpush.msrb.mxu3 %v3933_v40  ;;  %1204 = vmatmul.f32.vlgmr.msra.gmra.mxu2 %v3564_v12  ;;  %v1544_v12 = vld [vmem:[#allocation8 + $0xf0] sm:$0xff]  ;;  %v1657_v18 = vand.u32 4294901760, %v4210_v56 }
  0xd9   :  { %1305 = vmatmul.f32.vlgmr.msra.gmra.mxu3 %v3492_v20  ;;  %1347 = vmatpush.msrb.mxu0 %v3990_v27  ;;  %v4157_v29 = vand.u32 4294901760, %v1544_v12  ;;  %v1633_v24 = vand.u32 4294901760, %v4181_v59 }
  0xda   :  { %1384 = vmatpush.msrb.mxu1 %v3933_v40  ;;  %1453 = vmatpush.msrb.mxu2 %v1282_v33  ;;  %v4187_v40 = vand.u32 4294901760, %v1536_v7  ;;  %v1658_v35 = vsub.f32 %v4210_v56, %v1657_v18 }
  0xdb   :  { %1494 = vmatpush.msrb.mxu3 %v3949_v51  ;;  %1350 = vmatpush.msrb.mxu0 %v4003_v2  ;;  %v4161_v30 = vsub.f32 %v1544_v12, %v4157_v29  ;;  %v4274_v12 = vand.u32 4294901760, %v1518_v26 }
  0xdc   :  { %1386 = vmatpush.msrb.mxu1 %v3949_v51  ;;  %1457 = vmatpush.msrb.mxu2 %v1288_v6  ;;  %v1530_v51 = vld [vmem:[#allocation8 + $0x80] sm:$0xff]  ;;  %v4204_v27 = vsub.f32 %v1536_v7, %v4187_v40  ;;  %v5259_v7 = vand.u32 4294901760, %v4266_v61 }
  0xdd   :  { %1496 = vmatpush.msrb.mxu3 %v3967_v37  ;;  %1353 = vmatpush.msrb.mxu0 %v4013_v57  ;;  %v4212_v2 = vand.u32 4294901760, %v1530_v51  ;;  %v1634_v57 = vsub.f32 %v4181_v59, %v1633_v24 }
  0xde   :  { %1388 = vmatpush.msrb.mxu1 %v3967_v37  ;;  %1461 = vmatpush.msrb.mxu2 %v1294_v47  ;;  %v1645_v54 = vand.u32 4294901760, %v4204_v27  ;;  %v1682_v3 = vsub.f32 %v4266_v61, %v5259_v7 }
  0xdf   :  { %1498 = vmatpush.msrb.mxu3 %v3980_v38  ;;  %1356 = vmatpush.msrb.mxu0 %v4024_v42  ;;  %v4220_v42 = vand.u32 4294901760, %v1528_v13  ;;  %v4226_v60 = vsub.f32 %v1530_v51, %v4212_v2  ;;  %v4291_v51 = vsub.f32 %v1520_v11, %v4271_v41 }
  0xe0   :  { %1390 = vmatpush.msrb.mxu1 %v3980_v38  ;;  %1465 = vmatpush.msrb.mxu2 %v1300_v31  ;;  %v4189_v38 = vand.u32 4294901760, %v1534_v1  ;;  %v1635_v31 = vand.u32 4294901760, %v1634_v57  ;;  %v1646_v9 = vsub.f32 %v4204_v27, %v1645_v54  ;;  %v4301_v57 = vand.u32 4294901760, %v1576_v62 }
  0xe1   :  { %1500 = vmatpush.msrb.mxu3 %v3992_v14  ;;  %1359 = vmatmul.f32.vlgmr.msrb.gmra.mxu0 %v3516_v10  ;;  %v4163_v10 = vand.u32 4294901760, %v1542_v50  ;;  %v4235_v25 = vsub.f32 %v1528_v13, %v4220_v42  ;;  %v1663_v0 = vand.u32 4294901760, %v4226_v60  ;;  %v4294_v13 = vsub.f32 %v1518_v26, %v4274_v12 }
  0xe2   :  { %1467 = vmatmul.f32.vlgmr.msrb.gmra.mxu2 %v3492_v20  ;;  %1392 = vmatpush.msrb.mxu1 %v3992_v14  ;;  %v4207_v14 = vsub.f32 %v1534_v1, %v4189_v38  ;;  %v1647_v23 = vand.u32 4294901760, %v1646_v9  ;;  %v4284_v1 = vsub.f32 %v1522_v32, %v4268_v5  ;;  %v1572_v9 = vld [vmem:[#allocation8 + $0x1d0] sm:$0xff] }
  0xe3   :  { %1502 = vmatpush.msrb.mxu3 %v4005_v21  ;;  %1579 = vmatpush.msra.mxu0 %v4157_v29  ;;  %v4169_v15 = vsub.f32 %v1542_v50, %v4163_v10  ;;  %v1669_v36 = vand.u32 4294901760, %v4235_v25  ;;  %v1664_v4 = vsub.f32 %v4226_v60, %v1663_v0  ;;  %v4276_v50 = vand.u32 4294901760, %v1516_v46 }
  0xe4   :  { %1504 = vmatmul.f32.vlgmr.msrb.gmra.mxu3 %v3492_v20  ;;  %1394 = vmatpush.msrb.mxu1 %v4005_v21  ;;  %v1621_v20 = vand.u32 4294901760, %v4161_v30  ;;  %v1526_v21 = vld [vmem:[#allocation8 + $0x60] sm:$0xff]  ;;  %v1651_v47 = vand.u32 4294901760, %v4207_v14  ;;  %v5260_v11 = vand.u32 4294901760, %v4294_v13 }
  0xe5   :  { %1398 = vmatmul.f32.vlgmr.msrb.gmra.mxu1 %v3537_v17  ;;  %1775 = vmatpush.msra.mxu3 %v4157_v29  ;;  %v1538_v17 = vld [vmem:[#allocation8 + $0xc0] sm:$0xff]  ;;  %v1627_v22 = vand.u32 4294901760, %v4169_v15  ;;  %v4237_v53 = vand.u32 4294901760, %v1526_v21 }
  0xe6   :  { %1581 = vmatpush.msra.mxu0 %v4163_v10  ;;  %1722 = vmatpush.msra.mxu2 %v4161_v30  ;;  %v1622_v63 = vsub.f32 %v4161_v30, %v1621_v20  ;;  %v4183_v58 = vand.u32 4294901760, %v1538_v17  ;;  %v1652_v49 = vsub.f32 %v4207_v14, %v1651_v47  ;;  %v1568_v30 = vld [vmem:[#allocation8 + $0x1b0] sm:$0xff] }
  0xe7   :  { %1777 = vmatpush.msra.mxu3 %v4163_v10  ;;  %v1628_v37 = vsub.f32 %v4169_v15, %v1627_v22  ;;  %v4254_v39 = vsub.f32 %v1526_v21, %v4237_v53  ;;  %v1665_v21 = vand.u32 4294901760, %v1664_v4 }
  0xe8   :  { %1583 = vmatpush.msra.mxu0 %v4171_v44  ;;  %1725 = vmatpush.msra.mxu2 %v4169_v15  ;;  %v1623_v19 = vand.u32 4294901760, %v1622_v63  ;;  %v4199_v34 = vsub.f32 %v1538_v17, %v4183_v58  ;;  %v1653_v48 = vand.u32 4294901760, %v1652_v49  ;;  %v1659_v17 = vand.u32 4294901760, %v1658_v35  ;;  %v1566_v15 = vld [vmem:[#allocation8 + $0x1a0] sm:$0xff] }
  0xe9   :  { %1779 = vmatpush.msra.mxu3 %v4171_v44  ;;  %v1629_v33 = vand.u32 4294901760, %v1628_v37  ;;  %v5261_v55 = vand.u32 4294901760, %v4254_v39  ;;  %v1670_v63 = vsub.f32 %v4235_v25, %v1669_v36  ;;  %v1574_v37 = vld [vmem:[#allocation8 + $0x1e0] sm:$0xff]  ;;  %v4314_v35 = vsub.f32 %v1576_v62, %v4301_v57 }
  0xea   :  { %1585 = vmatpush.msra.mxu0 %v4183_v58  ;;  %1728 = vmatpush.msra.mxu2 %v4181_v59  ;;  %v1639_v6 = vand.u32 4294901760, %v4199_v34  ;;  %v4316_v32 = vand.u32 4294901760, %v1574_v37  ;;  %v4332_v62 = vand.u32 4294901760, %v1572_v9  ;;  %v1564_v59 = vld [vmem:[#allocation8 + $0x190] sm:$0xff] }
  0xeb   :  { %1781 = vmatpush.msra.mxu3 %v4183_v58  ;;  %1624 = vmatpush.msra.mxu1 %v1623_v19  ;;  %v1676_v8 = vsub.f32 %v4254_v39, %v5261_v55  ;;  %v4297_v19 = vand.u32 4294901760, %v1514_v43  ;;  %v1671_v49 = vand.u32 4294901760, %v1670_v63 }
  0xec   :  { %1587 = vmatpush.msra.mxu0 %v4187_v40  ;;  %1731 = vmatpush.msra.mxu2 %v4199_v34  ;;  %v1640_v16 = vsub.f32 %v4199_v34, %v1639_v6  ;;  %v4330_v4 = vsub.f32 %v1574_v37, %v4316_v32  ;;  %v4419_v34 = vand.u32 4294901760, %v1564_v59 }
  0xed   :  { %1783 = vmatpush.msra.mxu3 %v4187_v40  ;;  %1630 = vmatpush.msra.mxu1 %v1629_v33  ;;  %v5257_v33 = vand.u32 4294901760, %v4284_v1  ;;  %v4321_v26 = vsub.f32 %v1514_v43, %v4297_v19 }
  0xee   :  { %1589 = vmatpush.msra.mxu0 %v4189_v38  ;;  %1734 = vmatpush.msra.mxu2 %v4204_v27  ;;  %v1641_v28 = vand.u32 4294901760, %v1640_v16  ;;  %v4309_v16 = vsub.f32 %v1516_v46, %v4276_v50  ;;  %v1570_v46 = vld [vmem:[#allocation8 + $0x1c0] sm:$0xff]  ;;  %v5262_v37 = vand.u32 4294901760, %v4330_v4 }
  0xef   :  { %1785 = vmatpush.msra.mxu3 %v4189_v38  ;;  %1636 = vmatpush.msra.mxu1 %v1635_v31  ;;  %v5256_v31 = vand.u32 4294901760, %v4291_v51 }
  0xf0   :  { %1591 = vmatpush.msra.mxu0 %v4191_v52  ;;  %1737 = vmatpush.msra.mxu2 %v4207_v14  ;;  %v1705_v63 = vand.u32 4294901760, %v4309_v16  ;;  %v4430_v14 = vsub.f32 %v1564_v59, %v4419_v34  ;;  %v4487_v59 = vpop.f32.mrf.mxu2 }
  0xf1   :  { %1787 = vmatpush.msra.mxu3 %v4191_v52  ;;  %1642 = vmatpush.msra.mxu1 %v1641_v28  ;;  %v1677_v28 = vand.u32 4294901760, %v1676_v8  ;;  %v1694_v43 = vsub.f32 %v4291_v51, %v5256_v31  ;;  %v1700_v31 = vsub.f32 %v4294_v13, %v5260_v11 }
  0xf2   :  { %1593 = vmatpush.msra.mxu0 %v4212_v2  ;;  %1740 = vmatpush.msra.mxu2 %v4210_v56 }
  0xf3   :  { %1789 = vmatpush.msra.mxu3 %v4212_v2  ;;  %1648 = vmatpush.msra.mxu1 %v1647_v23  ;;  %v1688_v23 = vsub.f32 %v4284_v1, %v5257_v33  ;;  %v1711_v33 = vand.u32 4294901760, %v4321_v26  ;;  %v1695_v55 = vand.u32 4294901760, %v1694_v43 }
  0xf4   :  { %1595 = vmatpush.msra.mxu0 %v4220_v42  ;;  %1743 = vmatpush.msra.mxu2 %v4226_v60 }
  0xf5   :  { %1791 = vmatpush.msra.mxu3 %v4220_v42  ;;  %1654 = vmatpush.msra.mxu1 %v1653_v48  ;;  %v5258_v48 = vand.u32 4294901760, %v4314_v35  ;;  %v1712_v43 = vsub.f32 %v4321_v26, %v1711_v33 }
  0xf6   :  { %1597 = vmatpush.msra.mxu0 %v4237_v53  ;;  %1746 = vmatpush.msra.mxu2 %v4235_v25  ;;  %v5378_v25 = vand.u32 4294901760, %v4254_v39 }
  0xf7   :  { %1793 = vmatpush.msra.mxu3 %v4237_v53  ;;  %1660 = vmatpush.msra.mxu1 %v1659_v17  ;;  %v1683_v17 = vand.u32 4294901760, %v1682_v3  ;;  %v1963_v8 = vsub.f32 %v4314_v35, %v5258_v48  ;;  %v4348_v3 = vand.u32 4294901760, %v1570_v46 }
  0xf8   :  { %1599 = vmatpush.msra.mxu0 %v4256_v45  ;;  %1749 = vmatpush.msra.mxu2 %v4254_v39 }
  0xf9   :  { %1795 = vmatpush.msra.mxu3 %v4256_v45  ;;  %1666 = vmatpush.msra.mxu1 %v1665_v21  ;;  %v4346_v21 = vsub.f32 %v1572_v9, %v4332_v62  ;;  %v1969_v9 = vsub.f32 %v4330_v4, %v5262_v37  ;;  %v4362_v7 = vsub.f32 %v1570_v46, %v4348_v3  ;;  %v1964_v11 = vand.u32 4294901760, %v1963_v8 }
  0xfa   :  { %1601 = vmatpush.msra.mxu0 %v4268_v5  ;;  %1752 = vmatpush.msra.mxu2 %v4266_v61 }
  0xfb   :  { %1797 = vmatpush.msra.mxu3 %v4268_v5  ;;  %1672 = vmatpush.msra.mxu1 %v1671_v49  ;;  %v1689_v49 = vand.u32 4294901760, %v1688_v23  ;;  %v5263_v48 = vand.u32 4294901760, %v4346_v21  ;;  %v1980_v46 = vand.u32 4294901760, %v4362_v7  ;;  %v1970_v37 = vand.u32 4294901760, %v1969_v9 }
  0xfc   :  { %1603 = vmatpush.msra.mxu0 %v4271_v41  ;;  %1755 = vmatpush.msra.mxu2 %v4284_v1 }
  0xfd   :  { %1799 = vmatpush.msra.mxu3 %v4271_v41  ;;  %1678 = vmatpush.msra.mxu1 %v1677_v28  ;;  %v1706_v28 = vsub.f32 %v4309_v16, %v1705_v63  ;;  %v1975_v23 = vsub.f32 %v4346_v21, %v5263_v48  ;;  %v1981_v8 = vsub.f32 %v4362_v7, %v1980_v46 }
  0xfe   :  { %1605 = vmatpush.msra.mxu0 %v4274_v12  ;;  %1758 = vmatpush.msra.mxu2 %v4291_v51 }
  0xff   :  { %1801 = vmatpush.msra.mxu3 %v4274_v12  ;;  %1684 = vmatpush.msra.mxu1 %v1683_v17  ;;  %v1701_v17 = vand.u32 4294901760, %v1700_v31  ;;  %v1976_v48 = vand.u32 4294901760, %v1975_v23  ;;  %v1707_v9 = vand.u32 4294901760, %v1706_v28  ;;  %v1982_v31 = vand.u32 4294901760, %v1981_v8  ;;  %v1556_v28 = vld [vmem:[#allocation8 + $0x150] sm:$0xff] }
 0x100   :  { %1607 = vmatpush.msra.mxu0 %v4276_v50  ;;  %1761 = vmatpush.msra.mxu2 %v4294_v13 }
 0x101   :  { %1803 = vmatpush.msra.mxu3 %v4276_v50  ;;  %1690 = vmatpush.msra.mxu1 %v1689_v49  ;;  %v1713_v49 = vand.u32 4294901760, %v1712_v43  ;;  %v4472_v43 = vand.u32 4294901760, %v1556_v28 }
 0x102   :  { %1609 = vmatpush.msra.mxu0 %v4297_v19  ;;  %1764 = vmatpush.msra.mxu2 %v4309_v16 }
 0x103   :  { %1805 = vmatpush.msra.mxu3 %v4297_v19  ;;  %1696 = vmatpush.msra.mxu1 %v1695_v55 }
 0x104   :  { %1816 = vmatpush.msrb.mxu0 %v1621_v20  ;;  %1767 = vmatpush.msra.mxu2 %v4321_v26  ;;  %v4400_v20 = vand.u32 4294901760, %v1568_v30 }
 0x105   :  { %1965 = vmatpush.msrb.mxu3 %v1964_v11  ;;  %1702 = vmatpush.msra.mxu1 %v1701_v17 }
 0x106   :  { %1820 = vmatpush.msrb.mxu0 %v1627_v22  ;;  %1920 = vmatpush.msrb.mxu2 %v4301_v57  ;;  %v4409_v22 = vand.u32 4294901760, %v1566_v15 }
 0x107   :  { %1971 = vmatpush.msrb.mxu3 %v1970_v37  ;;  %1708 = vmatpush.msra.mxu1 %v1707_v9  ;;  %v1554_v9 = vld [vmem:[#allocation8 + $0x140] sm:$0xff] }
 0x108   :  { %1824 = vmatpush.msrb.mxu0 %v1633_v24  ;;  %1922 = vmatpush.msrb.mxu2 %v4316_v32  ;;  %v4417_v24 = vsub.f32 %v1566_v15, %v4409_v22  ;;  %v4485_v15 = vand.u32 4294901760, %v1554_v9 }
 0x109   :  { %1977 = vmatpush.msrb.mxu3 %v1976_v48  ;;  %1714 = vmatpush.msra.mxu1 %v1713_v49  ;;  %v4457_v48 = vpop.f32.mrf.mxu0 }
 0x10a   :  { %1828 = vmatpush.msrb.mxu0 %v1639_v6  ;;  %1924 = vmatpush.msrb.mxu2 %v4332_v62  ;;  %v1560_v6 = vld [vmem:[#allocation8 + $0x170] sm:$0xff] }
 0x10b   :  { %1983 = vmatpush.msrb.mxu3 %v1982_v31  ;;  %1883 = vmatpush.msrb.mxu1 %v4157_v29  ;;  %v4407_v29 = vsub.f32 %v1568_v30, %v4400_v20  ;;  %v4446_v60 = vand.u32 4294901760, %v1560_v6  ;;  %v4483_v30 = vsub.f32 %v1556_v28, %v4472_v43 }
 0x10c   :  { %1832 = vmatpush.msrb.mxu0 %v1645_v54  ;;  %1926 = vmatpush.msrb.mxu2 %v4348_v3 }
 0x10d   :  { %1885 = vmatpush.msrb.mxu1 %v4163_v10  ;;  %v1986_v10 = vand.u32 4294901760, %v4407_v29  ;;  %v4460_v37 = vsub.f32 %v1560_v6, %v4446_v60  ;;  %v5269_v6 = vand.u32 4294901760, %v4483_v30 }
 0x10e   :  { %1836 = vmatpush.msrb.mxu0 %v1651_v47  ;;  %1928 = vmatpush.msrb.mxu2 %v4400_v20  ;;  %v5273_v47 = vand.u32 4294901760, %v4430_v14 }
 0x10f   :  { %1887 = vmatpush.msrb.mxu1 %v4171_v44  ;;  %v1562_v44 = vld [vmem:[#allocation8 + $0x180] sm:$0xff]  ;;  %v1987_v27 = vsub.f32 %v4407_v29, %v1986_v10  ;;  %v5271_v8 = vand.u32 4294901760, %v4460_v37 }
 0x110   :  { %1840 = vmatpush.msrb.mxu0 %v1657_v18  ;;  %v4432_v56 = vand.u32 4294901760, %v1562_v44  ;;  %1930 = vmatpush.msrb.mxu2 %v4409_v22 }
 0x111   :  { %1889 = vmatpush.msrb.mxu1 %v4183_v58  ;;  %v5274_v58 = vand.u32 4294901760, %v4417_v24 }
 0x112   :  { %1844 = vmatpush.msrb.mxu0 %v1663_v0  ;;  %v4443_v18 = vsub.f32 %v1562_v44, %v4432_v56  ;;  %1932 = vmatpush.msrb.mxu2 %v4419_v34  ;;  %v1558_v0 = vld [vmem:[#allocation8 + $0x160] sm:$0xff]  ;;  %v1552_v44 = vld [vmem:[#allocation8 + $0x130] sm:$0xff] }
 0x113   :  { %1891 = vmatpush.msrb.mxu1 %v4187_v40  ;;  %v1988_v40 = vand.u32 4294901760, %v1987_v27  ;;  %v1993_v54 = vsub.f32 %v4417_v24, %v5274_v58  ;;  %v4455_v11 = vand.u32 4294901760, %v1558_v0 }
 0x114   :  { %1848 = vmatpush.msrb.mxu0 %v1669_v36  ;;  %v1999_v36 = vsub.f32 %v4430_v14, %v5273_v47  ;;  %v5272_v55 = vand.u32 4294901760, %v4443_v18  ;;  %1934 = vmatpush.msrb.mxu2 %v4432_v56 }
 0x115   :  { %1893 = vmatpush.msrb.mxu1 %v4189_v38  ;;  %1989 = vmatpush.msrb.mxu3 %v1988_v40  ;;  %v1994_v38 = vand.u32 4294901760, %v1993_v54  ;;  %v4470_v17 = vsub.f32 %v1558_v0, %v4455_v11  ;;  %v4501_v40 = vsub.f32 %v1554_v9, %v4485_v15  ;;  %v4503_v54 = vand.u32 4294901760, %v1552_v44 }
 0x116   :  { %1852 = vmatpush.msrb.mxu0 %v5378_v25  ;;  %v2000_v39 = vand.u32 4294901760, %v1999_v36  ;;  %v2005_v23 = vsub.f32 %v4443_v18, %v5272_v55  ;;  %1936 = vmatpush.msrb.mxu2 %v4446_v60  ;;  %v1550_v25 = vld [vmem:[#allocation8 + $0x120] sm:$0xff]  ;;  %v2023_v36 = vsub.f32 %v4483_v30, %v5269_v6 }
 0x117   :  { %1895 = vmatpush.msrb.mxu1 %v4191_v52  ;;  %v5379_v52 = vand.u32 4294901760, %v4266_v61  ;;  %1995 = vmatpush.msrb.mxu3 %v1994_v38  ;;  %v5380_v61 = vand.u32 4294901760, %v4284_v1  ;;  %v5270_v49 = vand.u32 4294901760, %v4470_v17  ;;  %v2011_v1 = vsub.f32 %v4460_v37, %v5271_v8 }
 0x118   :  { %v2006_v31 = vand.u32 4294901760, %v2005_v23  ;;  %1938 = vmatpush.msrb.mxu2 %v4455_v11  ;;  %v5268_v28 = vand.u32 4294901760, %v4501_v40  ;;  %v1548_v23 = vld [vmem:[#allocation8 + $0x110] sm:$0xff] }
 0x119   :  { %1856 = vmatpush.msrb.mxu0 %v5379_v52  ;;  %1897 = vmatpush.msrb.mxu1 %v4212_v2  ;;  %v4478_v2 = vpop.f32.mrf.mxu1  ;;  %v2017_v27 = vsub.f32 %v4470_v17, %v5270_v49  ;;  %v2012_v0 = vand.u32 4294901760, %v2011_v1  ;;  %v4514_v52 = vsub.f32 %v1552_v44, %v4503_v54  ;;  %v1546_v44 = vld [vmem:[#allocation8 + $0x100] sm:$0xff] }
 0x11a   :  { %2001 = vmatpush.msrb.mxu3 %v2000_v39  ;;  %1940 = vmatpush.msrb.mxu2 %v4472_v43  ;;  %v4516_v39 = vand.u32 4294901760, %v1550_v25  ;;  %v4539_v16 = vand.u32 4294901760, %v1546_v44 }
 0x11b   :  { %1860 = vmatpush.msrb.mxu0 %v5380_v61  ;;  %1899 = vmatpush.msrb.mxu1 %v4220_v42  ;;  %v5381_v42 = vand.u32 4294901760, %v4291_v51  ;;  %v5382_v51 = vand.u32 4294901760, %v4294_v13  ;;  %v2018_v38 = vand.u32 4294901760, %v2017_v27  ;;  %v2024_v13 = vand.u32 4294901760, %v2023_v36 }
 0x11c   :  { %2007 = vmatpush.msrb.mxu3 %v2006_v31  ;;  %1942 = vmatpush.msrb.mxu2 %v4485_v15  ;;  %v5267_v9 = vand.u32 4294901760, %v4514_v52  ;;  %v4524_v61 = vand.u32 4294901760, %v1548_v23  ;;  %v413_v31 = vpop.f32.mrf.mxu0  ;;  %v4529_v1 = vsub.f32 %v1550_v25, %v4516_v39 }
 0x11d   :  { %1864 = vmatpush.msrb.mxu0 %v5381_v42  ;;  %1901 = vmatpush.msrb.mxu1 %v4237_v53  ;;  %v344_v53 = vpop.f32.mrf.mxu3 }
 0x11e   :  { %2013 = vmatpush.msrb.mxu3 %v2012_v0  ;;  %1944 = vmatpush.msrb.mxu2 %v4503_v54  ;;  %v2035_v42 = vsub.f32 %v4514_v52, %v5267_v9  ;;  %v4537_v27 = vsub.f32 %v1548_v23, %v4524_v61  ;;  %v5266_v0 = vand.u32 4294901760, %v4529_v1 }
 0x11f   :  { %1868 = vmatpush.msrb.mxu0 %v5382_v51  ;;  %1903 = vmatpush.msrb.mxu1 %v4256_v45  ;;  %v2029_v45 = vsub.f32 %v4501_v40, %v5268_v28 }
 0x120   :  { %2019 = vmatpush.msrb.mxu3 %v2018_v38  ;;  %1946 = vmatpush.msrb.mxu2 %v4516_v39  ;;  %v2036_v25 = vand.u32 4294901760, %v2035_v42  ;;  %v5264_v51 = vand.u32 4294901760, %v4537_v27  ;;  %v4550_v38 = vsub.f32 %v1546_v44, %v4539_v16  ;;  %v252_v42 = vadd.f32 %v4478_v2, %v4457_v48 }
 0x121   :  { %1905 = vmatpush.msrb.mxu1 %v4268_v5  ;;  %1872 = vmatpush.msrb.mxu0 %v1705_v63  ;;  %v2030_v5 = vand.u32 4294901760, %v2029_v45  ;;  %v4543_v63 = vpop.f32.mrf.mxu2 }
 0x122   :  { %2025 = vmatpush.msrb.mxu3 %v2024_v13  ;;  %1948 = vmatpush.msrb.mxu2 %v4524_v61  ;;  %v5265_v36 = vand.u32 4294901760, %v4550_v38 }
 0x123   :  { %1907 = vmatpush.msrb.mxu1 %v4271_v41  ;;  %1876 = vmatpush.msrb.mxu0 %v1711_v33  ;;  %v450_v41 = vpop.f32.mrf.mxu1  ;;  %v2041_v33 = vsub.f32 %v4529_v1, %v5266_v0 }
 0x124   :  { %2031 = vmatpush.msrb.mxu3 %v2030_v5  ;;  %1950 = vmatpush.msrb.mxu2 %v4539_v16  ;;  %v2053_v45 = vsub.f32 %v4550_v38, %v5265_v36  ;;  %v4566_v44 = vpop.f32.mrf.mxu0 }
 0x125   :  { %1909 = vmatpush.msrb.mxu1 %v4274_v12  ;;  %v592_v26 = vpop.f32.mrf.mxu3  ;;  %v2047_v12 = vsub.f32 %v4537_v27, %v5264_v51  ;;  %v2042_v23 = vand.u32 4294901760, %v2041_v33 }
 0x126   :  { %2037 = vmatpush.msrb.mxu3 %v2036_v25 }
 0x127   :  { %1911 = vmatpush.msrb.mxu1 %v4276_v50  ;;  %v2048_v13 = vand.u32 4294901760, %v2047_v12  ;;  %v2054_v50 = vand.u32 4294901760, %v2053_v45 }
 0x128   :  { %2043 = vmatpush.msrb.mxu3 %v2042_v23 }
 0x129   :  { %1913 = vmatpush.msrb.mxu1 %v4297_v19  ;;  %v4572_v25 = vpop.f32.mrf.mxu2  ;;  %v306_v19 = vadd.f32 %v4487_v59, %v252_v42 }
 0x12a   :  { %2049 = vmatpush.msrb.mxu3 %v2048_v13 }
 0x12b   :  { %v4568_v5 = vpop.f32.mrf.mxu1  ;;  %v345_v36 = vadd.f32 %v344_v53, %v306_v19 }
 0x12c   :  { %2055 = vmatpush.msrb.mxu3 %v2054_v50 }
 0x12d   :  { %v4574_v33 = vpop.f32.mrf.mxu3  ;;  %v414_v13 = vadd.f32 %v413_v31, %v345_v36  ;;  %v1535_v36 = vld [vmem:[#allocation8 + $0xa8] sm:$0xff] }
 0x12f   :  { %v451_v8 = vadd.f32 %v450_v41, %v414_v13  ;;  %v4675_v13 = vand.u32 4294901760, %v1535_v36 }
 0x131   :  { %v1019_v9 = vpop.f32.mrf.mxu2  ;;  %v1508_v55 = vmul.f32 %v451_v8, %v451_v8  ;;  %v5383_v8 = vand.u32 4294901760, %v4314_v35 }
 0x135   :  { %v864_v12 = vpop.f32.mrf.mxu0 }
 0x138   :  { %v965_v51 = vpop.f32.mrf.mxu1 }
 0x139   :  { %v966_v0 = vadd.f32 %v965_v51, %v864_v12  ;;  %v5387_v51 = vand.u32 4294901760, %v4430_v14 }
 0x13b   :  { %v1020_v23 = vadd.f32 %v1019_v9, %v966_v0  ;;  %v1058_v45 = vpop.f32.mrf.mxu3  ;;  %v593_v9 = vadd.f32 %v592_v26, %v4543_v63 }
 0x13d   :  { %v1059_v28 = vadd.f32 %v1058_v45, %v1020_v23 }
 0x13e   :  { %v1127_v6 = vpop.f32.mrf.mxu0 }
 0x13f   :  { %v1128_v49 = vadd.f32 %v1127_v6, %v1059_v28  ;;  %v1545_v6 = vld [vmem:[#allocation8 + $0xf8] sm:$0xff]  ;;  %v1543_v28 = vld [vmem:[#allocation8 + $0xe8] sm:$0xff] }
 0x141   :  { %v1164_v48 = vpop.f32.mrf.mxu1 }
 0x142   :  { %v1165_v2 = vadd.f32 %v1164_v48, %v1128_v49  ;;  %v5384_v49 = vand.u32 4294901760, %v4330_v4 }
 0x144   :  { %v1510_v50 = vmul.f32 %v1165_v2, %v1165_v2  ;;  %v5390_v2 = vand.u32 4294901760, %v4470_v17 }
 0x146   :  { %v1512_v47 = vadd.f32 %v1510_v50, %v1508_v55 }
 0x148   :  { %v4577_v58 = vand.u32 4294901760, %v1512_v47 }
 0x14a   :  { %v4580_v59 = vsub.f32 %v1512_v47, %v4577_v58  ;;  %1716 = vmatmul.f32.vlgmr.msra.gmra.mxu1 %v4577_v58 }
 0x14b   :  { %2116 = vmatpush.msra.mxu1 %v4301_v57 }
 0x14c   :  { %1770 = vmatmul.f32.vlgmr.msra.gmra.mxu2 %v4580_v59  ;;  %v4586_v53 = vand.u32 4294901760, %v4580_v59 }
 0x14d   :  { %2118 = vmatpush.msra.mxu1 %v4316_v32  ;;  %2157 = vmatpush.msra.mxu2 %v5383_v8 }
 0x14e   :  { %1809 = vmatmul.f32.vlgmr.msra.gmra.mxu3 %v4586_v53  ;;  %v1613_v47 = vsub.f32 %v4580_v59, %v4586_v53 }
 0x14f   :  { %2120 = vmatpush.msra.mxu1 %v4332_v62  ;;  %2224 = vmatpush.msra.mxu3 %v4301_v57  ;;  %v5385_v57 = vand.u32 4294901760, %v4346_v21 }
 0x150   :  { %v4596_v55 = vand.u32 4294901760, %v1613_v47  ;;  %2161 = vmatpush.msra.mxu2 %v5384_v49 }
 0x151   :  { %2122 = vmatpush.msra.mxu1 %v4348_v3  ;;  %2226 = vmatpush.msra.mxu3 %v4316_v32  ;;  %v4619_v32 = vand.u32 4294901760, %v1543_v28 }
 0x152   :  { %1615 = vmatmul.f32.vlgmr.msra.gmra.mxu0 %v4596_v55  ;;  %1915 = vmatmul.f32.vlgmr.msrb.gmra.mxu1 %v4577_v58 }
 0x153   :  { %2063 = vmatpush.msra.mxu0 %v4314_v35  ;;  %2124 = vmatpush.msra.mxu1 %v4400_v20  ;;  %v4615_v35 = vand.u32 4294901760, %v1545_v6 }
 0x154   :  { %2228 = vmatpush.msra.mxu3 %v4332_v62  ;;  %2165 = vmatpush.msra.mxu2 %v5385_v57  ;;  %v1541_v62 = vld [vmem:[#allocation8 + $0xd8] sm:$0xff] }
 0x155   :  { %2066 = vmatpush.msra.mxu0 %v4330_v4  ;;  %2126 = vmatpush.msra.mxu1 %v4409_v22  ;;  %v647_v4 = vadd.f32 %v4566_v44, %v593_v9  ;;  %v5388_v44 = vand.u32 4294901760, %v4443_v18 }
 0x156   :  { %2230 = vmatpush.msra.mxu3 %v4348_v3  ;;  %2169 = vmatpush.msra.mxu2 %v1980_v46  ;;  %v1539_v3 = vld [vmem:[#allocation8 + $0xc8] sm:$0xff]  ;;  %v4632_v46 = vand.u32 4294901760, %v1541_v62 }
 0x157   :  { %2069 = vmatpush.msra.mxu0 %v4346_v21  ;;  %2128 = vmatpush.msra.mxu1 %v4419_v34  ;;  %v4630_v21 = vsub.f32 %v1545_v6, %v4615_v35  ;;  %v686_v63 = vadd.f32 %v4568_v5, %v647_v4  ;;  %v1529_v6 = vld [vmem:[#allocation8 + $0x78] sm:$0xff] }
 0x158   :  { %2232 = vmatpush.msra.mxu3 %v4400_v20  ;;  %2173 = vmatpush.msra.mxu2 %v1986_v10  ;;  %v4642_v10 = vand.u32 4294901760, %v1539_v3  ;;  %v4652_v26 = vsub.f32 %v1541_v62, %v4632_v46  ;;  %v4701_v62 = vsub.f32 %v1535_v36, %v4675_v13  ;;  %v1525_v36 = vld [vmem:[#allocation8 + $0x58] sm:$0xff] }
 0x159   :  { %2072 = vmatpush.msra.mxu0 %v4362_v7  ;;  %2130 = vmatpush.msra.mxu1 %v4432_v56  ;;  %v4637_v7 = vsub.f32 %v1543_v28, %v4619_v32  ;;  %v755_v42 = vadd.f32 %v4572_v25, %v686_v63  ;;  %v5391_v28 = vand.u32 4294901760, %v4483_v30  ;;  %v4717_v63 = vand.u32 4294901760, %v1529_v6 }
 0x15a   :  { %2234 = vmatpush.msra.mxu3 %v4409_v22  ;;  %1878 = vmatmul.f32.vlgmr.msrb.gmra.mxu0 %v4577_v58  ;;  %v5386_v22 = vand.u32 4294901760, %v4417_v24  ;;  %v5289_v45 = vand.u32 4294901760, %v4652_v26 }
 0x15b   :  { %v1205_v20 = vpop.f32.mrf.mxu2  ;;  %2075 = vmatpush.msra.mxu0 %v4407_v29  ;;  %2132 = vmatpush.msra.mxu1 %v4446_v60  ;;  %v1537_v29 = vld [vmem:[#allocation8 + $0xb8] sm:$0xff] }
 0x15c   :  { %v1306_v31 = vpop.f32.mrf.mxu3  ;;  %2236 = vmatpush.msra.mxu3 %v4419_v34  ;;  %2177 = vmatpush.msra.mxu2 %v5386_v22  ;;  %v5291_v34 = vand.u32 4294901760, %v4630_v21  ;;  %v4663_v5 = vand.u32 4294901760, %v1537_v29  ;;  %v2316_v9 = vsub.f32 %v4652_v26, %v5289_v45 }
 0x15d   :  { %v1307_v0 = vadd.f32 %v1306_v31, %v1205_v20  ;;  %2078 = vmatpush.msra.mxu0 %v4417_v24  ;;  %2134 = vmatpush.msra.mxu1 %v4455_v11  ;;  %v5290_v24 = vand.u32 4294901760, %v4637_v7 }
 0x15e   :  { %v1360_v41 = vpop.f32.mrf.mxu0  ;;  %2238 = vmatpush.msra.mxu3 %v4432_v56  ;;  %2181 = vmatpush.msra.mxu2 %v5387_v51  ;;  %v4661_v56 = vsub.f32 %v1539_v3, %v4642_v10  ;;  %v2304_v23 = vsub.f32 %v4630_v21, %v5291_v34  ;;  %v4687_v8 = vsub.f32 %v1537_v29, %v4663_v5  ;;  %v5392_v3 = vand.u32 4294901760, %v4501_v40 }
 0x15f   :  { %2081 = vmatpush.msra.mxu0 %v4430_v14  ;;  %2136 = vmatpush.msra.mxu1 %v4472_v43  ;;  %v1361_v19 = vadd.f32 %v1360_v41, %v1307_v0  ;;  %v1533_v14 = vld [vmem:[#allocation8 + $0x98] sm:$0xff]  ;;  %v5285_v29 = vand.u32 4294901760, %v4701_v62 }
 0x160   :  { %2240 = vmatpush.msra.mxu3 %v4446_v60  ;;  %2185 = vmatpush.msra.mxu2 %v5388_v44  ;;  %v5389_v60 = vand.u32 4294901760, %v4460_v37  ;;  %v5287_v50 = vand.u32 4294901760, %v4661_v56  ;;  %v4689_v47 = vand.u32 4294901760, %v1533_v14  ;;  %v5286_v31 = vand.u32 4294901760, %v4687_v8 }
 0x161   :  { %2084 = vmatpush.msra.mxu0 %v4443_v18  ;;  %2138 = vmatpush.msra.mxu1 %v4485_v15  ;;  %v2310_v18 = vsub.f32 %v4637_v7, %v5290_v24  ;;  %v1561_v24 = vld [vmem:[#allocation8 + $0x178] sm:$0xff] }
 0x162   :  { %v1399_v12 = vpop.f32.mrf.mxu1  ;;  %2242 = vmatpush.msra.mxu3 %v4455_v11  ;;  %2189 = vmatpush.msra.mxu2 %v5389_v60  ;;  %v1531_v11 = vld [vmem:[#allocation8 + $0x88] sm:$0xff]  ;;  %v2322_v20 = vsub.f32 %v4661_v56, %v5287_v50  ;;  %v4715_v22 = vsub.f32 %v1533_v14, %v4689_v47  ;;  %v4737_v14 = vsub.f32 %v1529_v6, %v4717_v63 }
 0x163   :  { %v1400_v25 = vadd.f32 %v1399_v12, %v1361_v19  ;;  %2087 = vmatpush.msra.mxu0 %v4460_v37  ;;  %2140 = vmatpush.msra.mxu1 %v4503_v54  ;;  %v792_v37 = vadd.f32 %v4574_v33, %v755_v42  ;;  %v4703_v33 = vand.u32 4294901760, %v1531_v11  ;;  %v2311_v4 = vand.u32 4294901760, %v2310_v18  ;;  %v1523_v12 = vld [vmem:[#allocation8 + $0x48] sm:$0xff] }
 0x164   :  { %2244 = vmatpush.msra.mxu3 %v4472_v43  ;;  %2193 = vmatpush.msra.mxu2 %v5390_v2  ;;  %v2305_v43 = vand.u32 4294901760, %v2304_v23  ;;  %v5393_v42 = vand.u32 4294901760, %v4514_v52  ;;  %v5284_v19 = vand.u32 4294901760, %v4715_v22  ;;  %v2334_v23 = vsub.f32 %v4701_v62, %v5285_v29  ;;  %v1565_v29 = vld [vmem:[#allocation8 + $0x198] sm:$0xff] }
 0x165   :  { %v1468_v48 = vpop.f32.mrf.mxu2  ;;  %2090 = vmatpush.msra.mxu0 %v4470_v17  ;;  %2142 = vmatpush.msra.mxu1 %v4516_v39  ;;  %v4724_v41 = vsub.f32 %v1531_v11, %v4703_v33  ;;  %v1521_v11 = vld [vmem:[#allocation8 + $0x38] sm:$0xff]  ;;  %v4907_v50 = vand.u32 4294901760, %v1565_v29 }
 0x166   :  { %v1469_v49 = vadd.f32 %v1468_v48, %v1400_v25  ;;  %2246 = vmatpush.msra.mxu3 %v4485_v15  ;;  %2197 = vmatpush.msra.mxu2 %v5391_v28  ;;  %v1527_v15 = vld [vmem:[#allocation8 + $0x68] sm:$0xff]  ;;  %v2340_v2 = vsub.f32 %v4715_v22, %v5284_v19  ;;  %v4775_v28 = vand.u32 4294901760, %v1521_v11 }
 0x167   :  { %v1505_v57 = vpop.f32.mrf.mxu3  ;;  %2093 = vmatpush.msra.mxu0 %v4483_v30  ;;  %2144 = vmatpush.msra.mxu1 %v4524_v61  ;;  %v1509_v30 = vmul.f32 %v792_v37, %v792_v37  ;;  %v4726_v51 = vand.u32 4294901760, %v1527_v15  ;;  %v5283_v25 = vand.u32 4294901760, %v4724_v41  ;;  %v5280_v37 = vand.u32 4294901760, %v4737_v14 }
 0x168   :  { %v1506_v17 = vadd.f32 %v1505_v57, %v1469_v49  ;;  %2248 = vmatpush.msra.mxu3 %v4503_v54  ;;  %2201 = vmatpush.msra.mxu2 %v5392_v3  ;;  %v2317_v54 = vand.u32 4294901760, %v2316_v9  ;;  %v1519_v49 = vld [vmem:[#allocation8 + $0x28] sm:$0xff]  ;;  %v5397_v57 = vand.u32 4294901760, %v4537_v27  ;;  %v2335_v9 = vand.u32 4294901760, %v2334_v23 }
 0x169   :  { %2096 = vmatpush.msra.mxu0 %v4501_v40  ;;  %2146 = vmatpush.msra.mxu1 %v4539_v16  ;;  %v2323_v40 = vand.u32 4294901760, %v2322_v20  ;;  %v4752_v18 = vsub.f32 %v1527_v15, %v4726_v51  ;;  %v1517_v15 = vld [vmem:[#allocation8 + $0x18] sm:$0xff]  ;;  %v4790_v20 = vand.u32 4294901760, %v1519_v49 }
 0x16a   :  { %v1511_v0 = vmul.f32 %v1506_v17, %v1506_v17  ;;  %2250 = vmatpush.msra.mxu3 %v4516_v39  ;;  %2205 = vmatpush.msra.mxu2 %v5393_v42  ;;  %v2328_v39 = vsub.f32 %v4687_v8, %v5286_v31  ;;  %v2346_v17 = vsub.f32 %v4724_v41, %v5283_v25  ;;  %v1563_v31 = vld [vmem:[#allocation8 + $0x188] sm:$0xff] }
 0x16b   :  { %2306 = vmatpush.msrb.mxu1 %v2305_v43  ;;  %2099 = vmatpush.msra.mxu0 %v4514_v52  ;;  %v5394_v52 = vand.u32 4294901760, %v4529_v1  ;;  %v4815_v23 = vsub.f32 %v1519_v49, %v4790_v20  ;;  %v4920_v45 = vand.u32 4294901760, %v1563_v31 }
 0x16c   :  { %v1513_v44 = vadd.f32 %v1511_v0, %v1509_v30  ;;  %2252 = vmatpush.msra.mxu3 %v4524_v61  ;;  %v4744_v61 = vand.u32 4294901760, %v1525_v36  ;;  %v2341_v30 = vand.u32 4294901760, %v2340_v2  ;;  %v2352_v0 = vsub.f32 %v4737_v14, %v5280_v37 }
 0x16d   :  { %2312 = vmatpush.msrb.mxu1 %v2311_v4  ;;  %2102 = vmatpush.msra.mxu0 %v4529_v1  ;;  %v4759_v1 = vand.u32 4294901760, %v1523_v12  ;;  %v5279_v4 = vand.u32 4294901760, %v4752_v18 }
 0x16e   :  { %v4739_v60 = vand.u32 4294901760, %v1513_v44  ;;  %2209 = vmatpush.msra.mxu2 %v5394_v52  ;;  %2254 = vmatpush.msra.mxu3 %v4539_v16  ;;  %v2329_v16 = vand.u32 4294901760, %v2328_v39  ;;  %v4773_v43 = vsub.f32 %v1525_v36, %v4744_v61  ;;  %v5398_v36 = vand.u32 4294901760, %v4550_v38 }
 0x16f   :  { %2318 = vmatpush.msrb.mxu1 %v2317_v54  ;;  %2105 = vmatpush.msra.mxu0 %v4537_v27  ;;  %v4788_v3 = vsub.f32 %v1523_v12, %v4759_v1  ;;  %v1515_v54 = vld [vmem:[#allocation8 + $0x8] sm:$0xff]  ;;  %v4805_v39 = vand.u32 4294901760, %v1517_v15  ;;  %v2347_v12 = vand.u32 4294901760, %v2346_v17  ;;  %v2358_v52 = vsub.f32 %v4752_v18, %v5279_v4 }
 0x170   :  { %v4755_v48 = vsub.f32 %v1513_v44, %v4739_v60  ;;  %2057 = vmatmul.f32.vlgmr.msrb.gmra.mxu3 %v4739_v60  ;;  %2213 = vmatpush.msra.mxu2 %v5397_v57  ;;  %v5277_v42 = vand.u32 4294901760, %v4773_v43  ;;  %v1571_v4 = vld [vmem:[#allocation8 + $0x1c8] sm:$0xff] }
 0x171   :  { %2457 = vmatpush.msrb.mxu3 %v4615_v35  ;;  %2324 = vmatpush.msrb.mxu1 %v2323_v40  ;;  %v4803_v40 = vsub.f32 %v1521_v11, %v4775_v28  ;;  %v4817_v11 = vand.u32 4294901760, %v1515_v54  ;;  %v2359_v49 = vand.u32 4294901760, %v2358_v52  ;;  %v1575_v52 = vld [vmem:[#allocation8 + $0x1e8] sm:$0xff] }
 0x172   :  { %5395 = vst [vmem:[#allocation17_spill] sm:$0xff] %v4755_v48  ;;  %2108 = vmatpush.msra.mxu0 %v4550_v38  ;;  %v4768_v6 = vand.u32 4294901760, %v4755_v48  ;;  %2217 = vmatpush.msra.mxu2 %v5398_v36  ;;  %v5275_v38 = vand.u32 4294901760, %v4788_v3  ;;  %v2364_v2 = vsub.f32 %v4773_v43, %v5277_v42 }
 0x173   :  { %2459 = vmatpush.msrb.mxu3 %v4619_v32  ;;  %2111 = vmatmul.f32.vlgmr.msra.gmra.mxu0 %v4755_v48  ;;  %v5276_v57 = vand.u32 4294901760, %v4803_v40 }
 0x174   :  { %5396 = vst [vmem:[#allocation15_spill] sm:$0xff] %v4768_v6  ;;  %2150 = vmatmul.f32.vlgmr.msra.gmra.mxu1 %v4768_v6  ;;  %2261 = vmatpush.msrb.mxu0 %v4615_v35  ;;  %v1954_v27 = vsub.f32 %v4755_v48, %v4768_v6  ;;  %v2370_v17 = vsub.f32 %v4788_v3, %v5275_v38  ;;  %v4938_v48 = vand.u32 4294901760, %v1561_v24  ;;  %v1557_v6 = vld [vmem:[#allocation8 + $0x158] sm:$0xff] }
 0x175   :  { %2330 = vmatpush.msrb.mxu1 %v2329_v16  ;;  %2461 = vmatpush.msrb.mxu3 %v4632_v46  ;;  %v2353_v16 = vand.u32 4294901760, %v2352_v0  ;;  %v1577_v0 = vld [vmem:[#allocation8 + $0x1f8] sm:$0xff]  ;;  %v2376_v36 = vsub.f32 %v4803_v40, %v5276_v57  ;;  %v4857_v57 = vand.u32 4294901760, %v1575_v52 }
 0x176   :  { %2263 = vmatpush.msrb.mxu0 %v4619_v32  ;;  %v4799_v44 = vand.u32 4294901760, %v1954_v27  ;;  %v5278_v27 = vand.u32 4294901760, %v4815_v23 }
 0x177   :  { %2336 = vmatpush.msrb.mxu1 %v2335_v9  ;;  %2463 = vmatpush.msrb.mxu3 %v4642_v10  ;;  %v4827_v9 = vsub.f32 %v1517_v15, %v4805_v39  ;;  %v2365_v15 = vand.u32 4294901760, %v2364_v2  ;;  %v2377_v42 = vand.u32 4294901760, %v2376_v36 }
 0x178   :  { %1956 = vmatmul.f32.vlgmr.msrb.gmra.mxu2 %v4799_v44  ;;  %2256 = vmatmul.f32.vlgmr.msra.gmra.mxu3 %v4739_v60  ;;  %v2382_v2 = vsub.f32 %v4815_v23, %v5278_v27 }
 0x179   :  { %2265 = vmatpush.msrb.mxu0 %v4632_v46  ;;  %2342 = vmatpush.msrb.mxu1 %v2341_v30  ;;  %v4837_v30 = vsub.f32 %v1515_v54, %v4817_v11  ;;  %v4847_v54 = vand.u32 4294901760, %v1577_v0 }
 0x17a   :  { %2404 = vmatpush.msrb.mxu2 %v4630_v21  ;;  %2465 = vmatpush.msrb.mxu3 %v4663_v5  ;;  %v2383_v37 = vand.u32 4294901760, %v2382_v2  ;;  %v1569_v2 = vld [vmem:[#allocation8 + $0x1b8] sm:$0xff] }
 0x17b   :  { %2267 = vmatpush.msrb.mxu0 %v4642_v10  ;;  %2348 = vmatpush.msrb.mxu1 %v2347_v12  ;;  %v5281_v12 = vand.u32 4294901760, %v4827_v9  ;;  %v5282_v38 = vand.u32 4294901760, %v4837_v30  ;;  %v4866_v27 = vsub.f32 %v1577_v0, %v4847_v54  ;;  %v4892_v19 = vand.u32 4294901760, %v1569_v2 }
 0x17c   :  { %2407 = vmatpush.msrb.mxu2 %v4637_v7  ;;  %2467 = vmatpush.msrb.mxu3 %v4675_v13 }
 0x17d   :  { %2269 = vmatpush.msrb.mxu0 %v4663_v5  ;;  %2354 = vmatpush.msrb.mxu1 %v2353_v16  ;;  %v2371_v16 = vand.u32 4294901760, %v2370_v17  ;;  %v2388_v17 = vsub.f32 %v4827_v9, %v5281_v12  ;;  %v4877_v12 = vsub.f32 %v1575_v52, %v4857_v57 }
 0x17e   :  { %2410 = vmatpush.msrb.mxu2 %v4652_v26  ;;  %2469 = vmatpush.msrb.mxu3 %v4689_v47 }
 0x17f   :  { %2271 = vmatpush.msrb.mxu0 %v4675_v13  ;;  %2360 = vmatpush.msrb.mxu1 %v2359_v49  ;;  %v1573_v49 = vld [vmem:[#allocation8 + $0x1d8] sm:$0xff]  ;;  %v2389_v0 = vand.u32 4294901760, %v2388_v17  ;;  %v5292_v17 = vand.u32 4294901760, %v4877_v12 }
 0x180   :  { %2413 = vmatpush.msrb.mxu2 %v4661_v56  ;;  %2471 = vmatpush.msrb.mxu3 %v4703_v33  ;;  %v4872_v36 = vand.u32 4294901760, %v1573_v49 }
 0x181   :  { %2219 = vmatmul.f32.vlgmr.msra.gmra.mxu2 %v4739_v60  ;;  %2273 = vmatpush.msrb.mxu0 %v4689_v47 }
 0x182   :  { %2366 = vmatpush.msrb.mxu1 %v2365_v15  ;;  %2416 = vmatpush.msrb.mxu2 %v4687_v8  ;;  %v2394_v15 = vsub.f32 %v4837_v30, %v5282_v38  ;;  %v5288_v38 = vand.u32 4294901760, %v4866_v27  ;;  %v4887_v52 = vsub.f32 %v1573_v49, %v4872_v36 }
 0x183   :  { %2473 = vmatpush.msrb.mxu3 %v4717_v63  ;;  %2275 = vmatpush.msrb.mxu0 %v4703_v33 }
 0x184   :  { %2372 = vmatpush.msrb.mxu1 %v2371_v16  ;;  %2419 = vmatpush.msrb.mxu2 %v4701_v62  ;;  %v4880_v16 = vand.u32 4294901760, %v1571_v4  ;;  %v2395_v25 = vand.u32 4294901760, %v2394_v15  ;;  %5399 = vst [vmem:[#allocation16_spill] sm:$0xff] %v4887_v52  ;;  %v2645_v49 = vsub.f32 %v4866_v27, %v5288_v38  ;;  %v4915_v38 = vsub.f32 %v1569_v2, %v4892_v19 }
 0x185   :  { %2475 = vmatpush.msrb.mxu3 %v4726_v51  ;;  %2277 = vmatpush.msrb.mxu0 %v4717_v63 }
 0x186   :  { %2378 = vmatpush.msrb.mxu1 %v2377_v42  ;;  %2422 = vmatpush.msrb.mxu2 %v4715_v22  ;;  %v1567_v42 = vld [vmem:[#allocation8 + $0x1a8] sm:$0xff]  ;;  %5401 = vst [vmem:[#allocation19_spill] sm:$0xff] %v4915_v38  ;;  %v2646_v34 = vand.u32 4294901760, %v2645_v49 }
 0x187   :  { %2477 = vmatpush.msrb.mxu3 %v4744_v61  ;;  %2279 = vmatpush.msrb.mxu0 %v4726_v51  ;;  %v4903_v15 = vand.u32 4294901760, %v1567_v42 }
 0x188   :  { %2384 = vmatpush.msrb.mxu1 %v2383_v37  ;;  %2425 = vmatpush.msrb.mxu2 %v4724_v41  ;;  %v4896_v37 = vsub.f32 %v1571_v4, %v4880_v16  ;;  %v2651_v4 = vsub.f32 %v4877_v12, %v5292_v17  ;;  %v4933_v17 = vsub.f32 %v1565_v29, %v4907_v50 }
 0x189   :  { %2479 = vmatpush.msrb.mxu3 %v4759_v1  ;;  %2281 = vmatpush.msrb.mxu0 %v4744_v61  ;;  %v4946_v29 = vsub.f32 %v1563_v31, %v4920_v45  ;;  %v5405_v31 = vand.u32 4294901760, %v4915_v38 }
 0x18a   :  { %2390 = vmatpush.msrb.mxu1 %v2389_v0  ;;  %2428 = vmatpush.msrb.mxu2 %v4737_v14  ;;  %5400 = vst [vmem:[#allocation18_spill] sm:$0xff] %v4896_v37  ;;  %v4925_v0 = vsub.f32 %v1567_v42, %v4903_v15  ;;  %v2652_v49 = vand.u32 4294901760, %v2651_v4  ;;  %v4962_v4 = vand.u32 4294901760, %v1557_v6 }
 0x18b   :  { %2481 = vmatpush.msrb.mxu3 %v4775_v28  ;;  %2283 = vmatpush.msrb.mxu0 %v4759_v1  ;;  %5403 = vst [vmem:[#allocation20_spill] sm:$0xff] %v4933_v17 }
 0x18c   :  { %2396 = vmatpush.msrb.mxu1 %v2395_v25  ;;  %2431 = vmatpush.msrb.mxu2 %v4752_v18  ;;  %v1559_v25 = vld [vmem:[#allocation8 + $0x168] sm:$0xff] }
 0x18d   :  { %2483 = vmatpush.msrb.mxu3 %v4790_v20  ;;  %2398 = vmatmul.f32.vlgmr.msrb.gmra.mxu1 %v4577_v58  ;;  %v4950_v42 = vand.u32 4294901760, %v1559_v25 }
 0x18e   :  { %2565 = vmatpush.msra.mxu1 %v4615_v35  ;;  %2285 = vmatpush.msrb.mxu0 %v4775_v28  ;;  %v5402_v35 = vand.u32 4294901760, %v4887_v52 }
 0x18f   :  { %2434 = vmatpush.msrb.mxu2 %v4773_v43  ;;  %2485 = vmatpush.msrb.mxu3 %v4805_v39 }
 0x190   :  { %2567 = vmatpush.msra.mxu1 %v4619_v32  ;;  %2287 = vmatpush.msrb.mxu0 %v4790_v20  ;;  %v2657_v2 = vsub.f32 %v4887_v52, %v5402_v35  ;;  %v5404_v32 = vand.u32 4294901760, %v4896_v37  ;;  %v1555_v52 = vld [vmem:[#allocation8 + $0x148] sm:$0xff] }
 0x191   :  { %2437 = vmatpush.msrb.mxu2 %v4788_v3  ;;  %2487 = vmatpush.msrb.mxu3 %v4817_v11 }
 0x192   :  { %2491 = vmatmul.f32.vlgmr.msrb.gmra.mxu3 %v4586_v53  ;;  %2569 = vmatpush.msra.mxu1 %v4632_v46  ;;  %v2663_v35 = vsub.f32 %v4896_v37, %v5404_v32  ;;  %v2658_v53 = vand.u32 4294901760, %v2657_v2  ;;  %v4960_v32 = vsub.f32 %v1561_v24, %v4938_v48  ;;  %v1553_v46 = vld [vmem:[#allocation8 + $0x138] sm:$0xff]  ;;  %v4976_v37 = vand.u32 4294901760, %v1555_v52 }
 0x193   :  { %2647 = vmatpush.msra.mxu3 %v2646_v34  ;;  %2289 = vmatpush.msrb.mxu0 %v4805_v39  ;;  %v2669_v34 = vsub.f32 %v4915_v38, %v5405_v31  ;;  %v5407_v31 = vand.u32 4294901760, %v4925_v0  ;;  %v4974_v38 = vsub.f32 %v1559_v25, %v4950_v42  ;;  %v4987_v25 = vsub.f32 %v1557_v6, %v4962_v4 }
 0x194   :  { %2440 = vmatpush.msrb.mxu2 %v4803_v40  ;;  %2571 = vmatpush.msra.mxu1 %v4642_v10  ;;  %v2664_v10 = vand.u32 4294901760, %v2663_v35  ;;  %v4989_v2 = vand.u32 4294901760, %v1553_v46  ;;  %v5000_v6 = vsub.f32 %v1555_v52, %v4976_v37 }
 0x195   :  { %2653 = vmatpush.msra.mxu3 %v2652_v49  ;;  %2291 = vmatpush.msrb.mxu0 %v4817_v11  ;;  %v5406_v49 = vand.u32 4294901760, %v4630_v21  ;;  %v2675_v24 = vsub.f32 %v4925_v0, %v5407_v31  ;;  %v1551_v21 = vld [vmem:[#allocation8 + $0x128] sm:$0xff]  ;;  %v2692_v31 = vand.u32 4294901760, %v4960_v32 }
 0x196   :  { %2443 = vmatpush.msrb.mxu2 %v4815_v23  ;;  %2297 = vmatmul.f32.vlgmr.msrb.gmra.mxu0 %v4596_v55  ;;  %v5408_v55 = vand.u32 4294901760, %v4933_v17  ;;  %v5013_v52 = vsub.f32 %v1553_v46, %v4989_v2 }
 0x197   :  { %2498 = vmatpush.msra.mxu0 %v5406_v49  ;;  %2573 = vmatpush.msra.mxu1 %v4663_v5  ;;  %v5409_v49 = vand.u32 4294901760, %v4637_v7  ;;  %v2670_v5 = vand.u32 4294901760, %v2669_v34  ;;  %v5411_v7 = vand.u32 4294901760, %v4652_v26  ;;  %v2698_v34 = vand.u32 4294901760, %v4974_v38 }
 0x198   :  { %2659 = vmatpush.msra.mxu3 %v2658_v53  ;;  %2446 = vmatpush.msrb.mxu2 %v4827_v9  ;;  %v2681_v35 = vsub.f32 %v4933_v17, %v5408_v55  ;;  %v5410_v53 = vand.u32 4294901760, %v4946_v29  ;;  %v1549_v17 = vld [vmem:[#allocation8 + $0x118] sm:$0xff]  ;;  %v2693_v26 = vsub.f32 %v4960_v32, %v2692_v31 }
 0x199   :  { %2502 = vmatpush.msra.mxu0 %v5409_v49  ;;  %2575 = vmatpush.msra.mxu1 %v4675_v13  ;;  %v2676_v13 = vand.u32 4294901760, %v2675_v24  ;;  %v5002_v49 = vand.u32 4294901760, %v1551_v21  ;;  %v2704_v24 = vand.u32 4294901760, %v4987_v25 }
 0x19a   :  { %2665 = vmatpush.msra.mxu3 %v2664_v10  ;;  %2449 = vmatpush.msrb.mxu2 %v4837_v30  ;;  %v2687_v55 = vsub.f32 %v4946_v29, %v5410_v53  ;;  %v2682_v10 = vand.u32 4294901760, %v2681_v35  ;;  %v1547_v53 = vld [vmem:[#allocation8 + $0x108] sm:$0xff]  ;;  %v2699_v35 = vsub.f32 %v4974_v38, %v2698_v34 }
 0x19b   :  { %2452 = vmatmul.f32.vlgmr.msrb.gmra.mxu2 %v4580_v59  ;;  %2506 = vmatpush.msra.mxu0 %v5411_v7  ;;  %v5412_v59 = vand.u32 4294901760, %v4661_v56  ;;  %v5015_v7 = vand.u32 4294901760, %v1549_v17  ;;  %v5413_v56 = vand.u32 4294901760, %v4687_v8  ;;  %v5026_v46 = vsub.f32 %v1551_v21, %v5002_v49 }
 0x19c   :  { %2577 = vmatpush.msra.mxu1 %v4689_v47  ;;  %2602 = vmatpush.msra.mxu2 %v4847_v54  ;;  %v2688_v47 = vand.u32 4294901760, %v2687_v55  ;;  %v2694_v8 = vand.u32 4294901760, %v2693_v26  ;;  %v2705_v55 = vsub.f32 %v4987_v25, %v2704_v24 }
 0x19d   :  { %2671 = vmatpush.msra.mxu3 %v2670_v5  ;;  %2510 = vmatpush.msra.mxu0 %v5412_v59  ;;  %v2710_v5 = vand.u32 4294901760, %v5000_v6  ;;  %v5028_v59 = vand.u32 4294901760, %v1547_v53  ;;  %v5039_v21 = vsub.f32 %v1549_v17, %v5015_v7  ;;  %v2722_v26 = vand.u32 4294901760, %v5026_v46 }
 0x19e   :  { %2579 = vmatpush.msra.mxu1 %v4703_v33  ;;  %2604 = vmatpush.msra.mxu2 %v4857_v57  ;;  %v5414_v33 = vand.u32 4294901760, %v4701_v62  ;;  %v2700_v62 = vand.u32 4294901760, %v2699_v35 }
 0x19f   :  { %2677 = vmatpush.msra.mxu3 %v2676_v13  ;;  %2514 = vmatpush.msra.mxu0 %v5413_v56  ;;  %v2716_v13 = vand.u32 4294901760, %v5013_v52  ;;  %v5050_v56 = vsub.f32 %v1547_v53, %v5028_v59 }
 0x1a0   :  { %2581 = vmatpush.msra.mxu1 %v4717_v63  ;;  %2606 = vmatpush.msra.mxu2 %v4872_v36  ;;  %v5415_v63 = vand.u32 4294901760, %v4715_v22  ;;  %v2706_v22 = vand.u32 4294901760, %v2705_v55 }
 0x1a1   :  { %2683 = vmatpush.msra.mxu3 %v2682_v10  ;;  %2518 = vmatpush.msra.mxu0 %v5414_v33  ;;  %v2711_v10 = vsub.f32 %v5000_v6, %v2710_v5  ;;  %v2717_v17 = vsub.f32 %v5013_v52, %v2716_v13  ;;  %v2734_v35 = vand.u32 4294901760, %v5050_v56 }
 0x1a2   :  { %2583 = vmatpush.msra.mxu1 %v4726_v51  ;;  %2608 = vmatpush.msra.mxu2 %v4880_v16  ;;  %v5416_v51 = vand.u32 4294901760, %v4724_v41  ;;  %v2723_v41 = vsub.f32 %v5026_v46, %v2722_v26 }
 0x1a3   :  { %2689 = vmatpush.msra.mxu3 %v2688_v47  ;;  %2522 = vmatpush.msra.mxu0 %v5415_v63  ;;  %v2728_v47 = vand.u32 4294901760, %v5039_v21  ;;  %v2712_v53 = vand.u32 4294901760, %v2711_v10  ;;  %v2718_v33 = vand.u32 4294901760, %v2717_v17  ;;  %v2735_v55 = vsub.f32 %v5050_v56, %v2734_v35 }
 0x1a4   :  { %2585 = vmatpush.msra.mxu1 %v4744_v61  ;;  %2610 = vmatpush.msra.mxu2 %v4892_v19  ;;  %v5417_v61 = vand.u32 4294901760, %v4737_v14  ;;  %v5421_v63 = vand.u32 4294901760, %v4803_v40  ;;  %v5423_v40 = vand.u32 4294901760, %v4827_v9  ;;  %v5429_v9 = vld [vmem:[#allocation19_spill] sm:$0xff] }
 0x1a5   :  { %2695 = vmatpush.msra.mxu3 %v2694_v8  ;;  %2526 = vmatpush.msra.mxu0 %v5416_v51  ;;  %v2729_v14 = vsub.f32 %v5039_v21, %v2728_v47  ;;  %v5419_v8 = vand.u32 4294901760, %v4773_v43  ;;  %v2736_v43 = vand.u32 4294901760, %v2735_v55 }
 0x1a6   :  { %2587 = vmatpush.msra.mxu1 %v4759_v1  ;;  %2612 = vmatpush.msra.mxu2 %v4903_v15  ;;  %v5418_v1 = vand.u32 4294901760, %v4752_v18  ;;  %v5420_v18 = vand.u32 4294901760, %v4788_v3  ;;  %v5422_v3 = vand.u32 4294901760, %v4815_v23  ;;  %v5425_v23 = vld [vmem:[#allocation16_spill] sm:$0xff] }
 0x1a7   :  { %2701 = vmatpush.msra.mxu3 %v2700_v62  ;;  %2530 = vmatpush.msra.mxu0 %v5417_v61 }
 0x1a8   :  { %2589 = vmatpush.msra.mxu1 %v4775_v28  ;;  %2614 = vmatpush.msra.mxu2 %v4907_v50  ;;  %v2724_v28 = vand.u32 4294901760, %v2723_v41 }
 0x1a9   :  { %2707 = vmatpush.msra.mxu3 %v2706_v22  ;;  %2534 = vmatpush.msra.mxu0 %v5418_v1 }
 0x1aa   :  { %2591 = vmatpush.msra.mxu1 %v4790_v20  ;;  %2616 = vmatpush.msra.mxu2 %v4920_v45  ;;  %v2730_v20 = vand.u32 4294901760, %v2729_v14 }
 0x1ab   :  { %2713 = vmatpush.msra.mxu3 %v2712_v53  ;;  %2538 = vmatpush.msra.mxu0 %v5419_v8 }
 0x1ac   :  { %2593 = vmatpush.msra.mxu1 %v4805_v39  ;;  %2618 = vmatpush.msra.mxu2 %v4938_v48  ;;  %v5424_v39 = vand.u32 4294901760, %v4837_v30  ;;  %v5433_v30 = vand.u32 4294901760, %v5429_v9 }
 0x1ad   :  { %2719 = vmatpush.msra.mxu3 %v2718_v33  ;;  %2542 = vmatpush.msra.mxu0 %v5420_v18 }
 0x1ae   :  { %2595 = vmatpush.msra.mxu1 %v4817_v11  ;;  %2620 = vmatpush.msra.mxu2 %v4950_v42  ;;  %v5427_v11 = vld [vmem:[#allocation18_spill] sm:$0xff] }
 0x1af   :  { %2725 = vmatpush.msra.mxu3 %v2724_v28  ;;  %2597 = vmatmul.f32.vlgmr.msra.gmra.mxu1 %v4577_v58 }
 0x1b0   :  { %2798 = vmatpush.msrb.mxu1 %v4847_v54  ;;  %2546 = vmatpush.msra.mxu0 %v5421_v63 }
 0x1b1   :  { %2622 = vmatpush.msra.mxu2 %v4962_v4  ;;  %2731 = vmatpush.msra.mxu3 %v2730_v20 }
 0x1b2   :  { %2800 = vmatpush.msrb.mxu1 %v4857_v57  ;;  %2550 = vmatpush.msra.mxu0 %v5422_v3 }
 0x1b3   :  { %2624 = vmatpush.msra.mxu2 %v4976_v37  ;;  %2737 = vmatpush.msra.mxu3 %v2736_v43 }
 0x1b4   :  { %2739 = vmatmul.f32.vlgmr.msra.gmra.mxu3 %v4739_v60  ;;  %2802 = vmatpush.msrb.mxu1 %v4872_v36 }
 0x1b5   :  { %2906 = vmatpush.msrb.mxu3 %v4847_v54  ;;  %2554 = vmatpush.msra.mxu0 %v5423_v40 }
 0x1b6   :  { %2626 = vmatpush.msra.mxu2 %v4989_v2  ;;  %2804 = vmatpush.msrb.mxu1 %v4880_v16 }
 0x1b7   :  { %2908 = vmatpush.msrb.mxu3 %v4857_v57  ;;  %2558 = vmatpush.msra.mxu0 %v5424_v39  ;;  %v5428_v57 = vand.u32 4294901760, %v4877_v12 }
 0x1b8   :  { %2628 = vmatpush.msra.mxu2 %v5002_v49  ;;  %2560 = vmatmul.f32.vlgmr.msra.gmra.mxu0 %v4577_v58  ;;  %v5426_v58 = vand.u32 4294901760, %v4866_v27 }
 0x1b9   :  { %2745 = vmatpush.msrb.mxu0 %v4866_v27  ;;  %2806 = vmatpush.msrb.mxu1 %v4892_v19  ;;  %v5432_v27 = vld [vmem:[#allocation20_spill] sm:$0xff] }
 0x1ba   :  { %2910 = vmatpush.msrb.mxu3 %v4872_v36  ;;  %2630 = vmatpush.msra.mxu2 %v5015_v7 }
 0x1bb   :  { %2748 = vmatpush.msrb.mxu0 %v4877_v12  ;;  %2808 = vmatpush.msrb.mxu1 %v4903_v15  ;;  %v5437_v12 = vld [vmem:[#allocation15_spill] sm:$0xff] }
 0x1bc   :  { %2912 = vmatpush.msrb.mxu3 %v4880_v16  ;;  %2632 = vmatpush.msra.mxu2 %v5028_v59 }
 0x1bd   :  { %2638 = vmatmul.f32.vlgmr.msra.gmra.mxu2 %v4799_v44  ;;  %2751 = vmatpush.msrb.mxu0 %v5425_v23  ;;  %v5430_v44 = vand.u32 4294901760, %v5425_v23 }
 0x1be   :  { %2810 = vmatpush.msrb.mxu1 %v4907_v50  ;;  %2839 = vmatpush.msrb.mxu2 %v5426_v58 }
 0x1bf   :  { %2914 = vmatpush.msrb.mxu3 %v4892_v19  ;;  %2754 = vmatpush.msrb.mxu0 %v5427_v11  ;;  %v5431_v19 = vand.u32 4294901760, %v5427_v11 }
 0x1c0   :  { %2812 = vmatpush.msrb.mxu1 %v4920_v45  ;;  %2843 = vmatpush.msrb.mxu2 %v5428_v57 }
 0x1c1   :  { %2916 = vmatpush.msrb.mxu3 %v4903_v15  ;;  %2757 = vmatpush.msrb.mxu0 %v5429_v9 }
 0x1c2   :  { %2814 = vmatpush.msrb.mxu1 %v4938_v48  ;;  %2847 = vmatpush.msrb.mxu2 %v5430_v44 }
 0x1c3   :  { %2918 = vmatpush.msrb.mxu3 %v4907_v50  ;;  %2760 = vmatpush.msrb.mxu0 %v4925_v0  ;;  %v5434_v50 = vand.u32 4294901760, %v4925_v0 }
 0x1c4   :  { %2816 = vmatpush.msrb.mxu1 %v4950_v42  ;;  %2851 = vmatpush.msrb.mxu2 %v5431_v19 }
 0x1c5   :  { %2920 = vmatpush.msrb.mxu3 %v4920_v45  ;;  %2763 = vmatpush.msrb.mxu0 %v5432_v27  ;;  %v5435_v45 = vand.u32 4294901760, %v5432_v27 }
 0x1c6   :  { %2818 = vmatpush.msrb.mxu1 %v4962_v4  ;;  %2855 = vmatpush.msrb.mxu2 %v5433_v30 }
 0x1c7   :  { %2922 = vmatpush.msrb.mxu3 %v4938_v48  ;;  %2766 = vmatpush.msrb.mxu0 %v4946_v29  ;;  %v5436_v48 = vand.u32 4294901760, %v4946_v29  ;;  %v1717_v36 = vpop.f32.mrf.mxu1 }
 0x1c8   :  { %2820 = vmatpush.msrb.mxu1 %v4976_v37  ;;  %2859 = vmatpush.msrb.mxu2 %v5434_v50 }
 0x1c9   :  { %2924 = vmatpush.msrb.mxu3 %v4950_v42  ;;  %2769 = vmatpush.msrb.mxu0 %v4960_v32 }
 0x1ca   :  { %2822 = vmatpush.msrb.mxu1 %v4989_v2  ;;  %2863 = vmatpush.msrb.mxu2 %v5435_v45 }
 0x1cb   :  { %2926 = vmatpush.msrb.mxu3 %v4962_v4  ;;  %2772 = vmatpush.msrb.mxu0 %v4974_v38  ;;  %v5438_v38 = vld [vmem:[#allocation17_spill] sm:$0xff] }
 0x1cc   :  { %2824 = vmatpush.msrb.mxu1 %v5002_v49  ;;  %2867 = vmatpush.msrb.mxu2 %v5436_v48 }
 0x1cd   :  { %2928 = vmatpush.msrb.mxu3 %v4976_v37  ;;  %2775 = vmatpush.msrb.mxu0 %v4987_v25 }
 0x1ce   :  { %2826 = vmatpush.msrb.mxu1 %v5015_v7  ;;  %2871 = vmatpush.msrb.mxu2 %v2692_v31 }
 0x1cf   :  { %2930 = vmatpush.msrb.mxu3 %v4989_v2  ;;  %2778 = vmatpush.msrb.mxu0 %v5000_v6  ;;  %v1616_v54 = vpop.f32.mrf.mxu0  ;;  %v1771_v16 = vpop.f32.mrf.mxu2 }
 0x1d0   :  { %2828 = vmatpush.msrb.mxu1 %v5028_v59  ;;  %2875 = vmatpush.msrb.mxu2 %v2698_v34  ;;  %v1916_v42 = vpop.f32.mrf.mxu1  ;;  %v1718_v31 = vadd.f32 %v1717_v36, %v1616_v54 }
 0x1d1   :  { %2932 = vmatpush.msrb.mxu3 %v5002_v49  ;;  %2832 = vmatmul.f32.vlgmr.msrb.gmra.mxu1 %v5437_v12  ;;  %v1810_v37 = vpop.f32.mrf.mxu3 }
 0x1d2   :  { %2781 = vmatpush.msrb.mxu0 %v5013_v52  ;;  %2879 = vmatpush.msrb.mxu2 %v2704_v24  ;;  %v1772_v25 = vadd.f32 %v1771_v16, %v1718_v31 }
 0x1d3   :  { %2934 = vmatpush.msrb.mxu3 %v5015_v7 }
 0x1d4   :  { %2784 = vmatpush.msrb.mxu0 %v5026_v46  ;;  %2883 = vmatpush.msrb.mxu2 %v2710_v5  ;;  %v1811_v52 = vadd.f32 %v1810_v37, %v1772_v25 }
 0x1d5   :  { %2936 = vmatpush.msrb.mxu3 %v5028_v59 }
 0x1d6   :  { %2938 = vmatmul.f32.vlgmr.msrb.gmra.mxu3 %v4739_v60  ;;  %2787 = vmatpush.msrb.mxu0 %v5039_v21 }
 0x1d7   :  { %2887 = vmatpush.msrb.mxu2 %v2716_v13  ;;  %v1879_v15 = vpop.f32.mrf.mxu0 }
 0x1d8   :  { %2790 = vmatpush.msrb.mxu0 %v5050_v56 }
 0x1d9   :  { %2891 = vmatpush.msrb.mxu2 %v2722_v26  ;;  %2793 = vmatmul.f32.vlgmr.msrb.gmra.mxu0 %v5438_v38 }
 0x1db   :  { %2895 = vmatpush.msrb.mxu2 %v2728_v47 }
 0x1dd   :  { %2899 = vmatpush.msrb.mxu2 %v2734_v35 }
 0x1de   :  { %2901 = vmatmul.f32.vlgmr.msrb.gmra.mxu2 %v4739_v60  ;;  %v1880_v60 = vadd.f32 %v1879_v15, %v1811_v52 }
 0x1e0   :  { %v1917_v13 = vadd.f32 %v1916_v42, %v1880_v60 }
 0x1f0   :  { %v2112_v4 = vpop.f32.mrf.mxu0 }
 0x1f1   :  { %v2151_v32 = vpop.f32.mrf.mxu1 }
 0x1f3   :  { %v2058_v29 = vpop.f32.mrf.mxu3 }
 0x1fb   :  { %v1957_v0 = vpop.f32.mrf.mxu2  ;;  %v2257_v34 = vpop.f32.mrf.mxu3 }
 0x1fc   :  { %v1958_v62 = vadd.f32 %v1957_v0, %v1917_v13 }
 0x1fe   :  { %v2059_v51 = vadd.f32 %v2058_v29, %v1958_v62 }
 0x200   :  { %v2113_v47 = vadd.f32 %v2112_v4, %v2059_v51 }
 0x202   :  { %v2152_v35 = vadd.f32 %v2151_v32, %v2113_v47 }
 0x204   :  { %v2220_v2 = vpop.f32.mrf.mxu2 }
 0x205   :  { %v2221_v14 = vadd.f32 %v2220_v2, %v2152_v35 }
 0x207   :  { %v2258_v20 = vadd.f32 %v2257_v34, %v2221_v14 }
 0x20a   :  { %v2399_v49 = vpop.f32.mrf.mxu1 }
 0x213   :  { %v2298_v6 = vpop.f32.mrf.mxu0 }
 0x214   :  { %v2400_v7 = vadd.f32 %v2399_v49, %v2298_v6 }
 0x215   :  { %v2492_v46 = vpop.f32.mrf.mxu3 }
 0x21e   :  { %v2453_v24 = vpop.f32.mrf.mxu2 }
 0x21f   :  { %v2454_v5 = vadd.f32 %v2453_v24, %v2400_v7 }
 0x221   :  { %v2493_v21 = vadd.f32 %v2492_v46, %v2454_v5 }
 0x22c   :  { %v2598_v26 = vpop.f32.mrf.mxu1 }
 0x235   :  { %v2561_v59 = vpop.f32.mrf.mxu0 }
 0x236   :  { %v2562_v10 = vadd.f32 %v2561_v59, %v2493_v21 }
 0x237   :  { %v2740_v61 = vpop.f32.mrf.mxu3 }
 0x238   :  { %v2599_v22 = vadd.f32 %v2598_v26, %v2562_v10 }
 0x240   :  { %v2639_v56 = vpop.f32.mrf.mxu2 }
 0x241   :  { %v2640_v17 = vadd.f32 %v2639_v56, %v2599_v22 }
 0x243   :  { %v2741_v41 = vadd.f32 %v2740_v61, %v2640_v17 }
 0x24e   :  { %v2833_v33 = vpop.f32.mrf.mxu1 }
 0x256   :  { %v2794_v53 = vpop.f32.mrf.mxu0 }
 0x257   :  { %v2795_v1 = vadd.f32 %v2794_v53, %v2741_v41 }
 0x259   :  { %v2834_v8 = vadd.f32 %v2833_v33, %v2795_v1  ;;  %v2939_v18 = vpop.f32.mrf.mxu3 }
 0x261   :  { %v2902_v28 = vpop.f32.mrf.mxu2 }
 0x262   :  { %v2903_v55 = vadd.f32 %v2902_v28, %v2834_v8 }
 0x264   :  { %v2940_v43 = vadd.f32 %v2939_v18, %v2903_v55 }
 0x266   :  { %v2942_v63 = vmax.f32 %v2258_v20, %v2940_v43 }
 0x268   :  { %2943 = vmax.xlane.f32.xlu0 %v2942_v63 }
 0x2db   :  { %v2944_v3 = vpop.xlane.xlu0 %2943 }
 0x2dc   :  { %v2945_v40 = vmax.f32 %v2944_v3, 1e-06 }
 0x2de   :  { %2988 = vrcp.f32 %v2945_v40  ;;  %v2957_v11 = vand.u32 2147483648, %v2945_v40  ;;  %v2955_v9 = vand.u32 2147483647, %v2945_v40  ;;  %vm2951_vm1 = vweird.f32 %v2945_v40 }
 0x2e0   :  { %v2958_v19 = vor.u32 1.1754944e-38, %v2957_v11  ;;  %vm2956_vm3 = vcmp.eq.f32.partialorder %v2955_v9, 8.507059e+37 }
 0x2e4   :  { %v2989_v39 = vpop.eup %2988 }
 0x2e5   :  { %v2947_v23 = vmul.f32 %v2989_v39, %v2945_v40  ;;  %vm2952_vm0 = vweird.f32 %v2989_v39 }
 0x2e6   :  { %vm2953_vm2 = vmor %vm2951_vm1, %vm2952_vm0 }
 0x2e7   :  { %v2948_v58 = vsub.f32 1.0, %v2947_v23 }
 0x2e9   :  { %v2949_v57 = vmul.f32 %v2989_v39, %v2948_v58 }
 0x2eb   :  { %v2950_v44 = vadd.f32 %v2989_v39, %v2949_v57 }
 0x2ed   :  { %v2954_v27 = vsel %vm2953_vm2, %v2989_v39, %v2950_v44 }
 0x2ee   :  { %v2959_v30 = vsel %vm2956_vm3, %v2958_v19, %v2954_v27 }
 0x2ef   :  { %v2960_v50 = vmul.f32 %v2959_v30, %v2258_v20 }
 0x2f1   :  { %2961 = vst [vmem:[#allocation10] sm:$0xff] %v2960_v50 }
 0x2f2   :  { %2972 = dma.vmem_to_hbm [thread:$0]  %s2968_s3, 128, %s2970_s11, [#allocation4]  }
 0x2f3   :  { %3116 = dma.done.wait [#allocation4], 128  }
 0x2f4   :  { %3117 = vsyncadd [#allocation4], 4294967168 }
 0x2f5   :  { %2977 = vsyncpa [#allocation3], 1 }
 0x2f6   :  { %2978 = vsyncpa [#allocation6], 1 }
 0x2f7   :  { %2979 = vsyncpa [#allocation9], 1 }
 0x2f8   :  { %2980 = vsyncpa [#allocation4], 1 }

</bundles_post_ra>
